<compile_context>
chip_gen: v5e
topology: v5e:2x2
jax: 0.10.0
libtpu: 0.0.40
codegen_flags: <defaults>
</compile_context>

<pallas_src>
import functools

import jax
import jax.numpy as jnp
from jax.experimental import pallas as pl
from jax.experimental.pallas import tpu as pltpu

BN_EPS = 1e-5                        # torch.nn.BatchNorm2d default
LANE = 128                           # TPU lane width
TM1_TARGET = 512                     # pass-1 GEMM rows per block
TM2_TARGET = 2048                    # pass-2 streaming rows per block
FUSE_M_MAX = 2048                    # fast path: max padded rows in one block
FUSE_VMEM_BUDGET = 20 * 1024 * 1024  # fast path: operand budget (headroom kept)
PASS2_VMEM_BUDGET = 24 * 1024 * 1024
VMEM_LIMIT = 32 * 1024 * 1024        # scoped-VMEM cap (safe on v5e/v6e/v7x)


def _round_up(x, m):
    return (x + m - 1) // m * m


def _round_lanes(n):
    # 256-wide output tiles feed the 256x256 MXUs on v6e/v7x; keep 128 for
    # narrow layers so zero-padding waste stays low.
    return _round_up(n, 256 if n >= 256 else LANE)


def _match_rows(arr, rows):
    """Pad/trim the leading dim; padded rows only touch discarded output rows."""
    if arr.shape[0] == rows:
        return arr
    if arr.shape[0] > rows:
        return arr[:rows]
    return jnp.pad(arr, ((0, rows - arr.shape[0]), (0, 0)))


# ---------------------------------------------------------------------------
# Fused single-call kernel: GEMM + BN(train) stats + normalize + residual/ReLU
# Used when the whole (M_p, K_p) x (K_p, C_p) problem fits comfortably in VMEM.
# ---------------------------------------------------------------------------
def _fused_conv_bn_kernel(a_ref, w_ref, g_ref, b_ref, *rest,
                          m_real, relu, add_res, eps):
    if add_res:
        r_ref, o_ref = rest
    else:
        (o_ref,) = rest

    acc = jnp.dot(a_ref[...], w_ref[...], preferred_element_type=jnp.float32)
    # Padded rows of `a` and padded cols of `w` are zero, so they contribute
    # nothing to the sums; the divisor uses the real row count.
    inv_m = 1.0 / float(m_real)
    mean = jnp.sum(acc, axis=0, keepdims=True) * inv_m
    var = jnp.maximum(jnp.sum(acc * acc, axis=0, keepdims=True) * inv_m
                      - mean * mean, 0.0)            # biased (training) var
    scale = jax.lax.rsqrt(var + eps) * g_ref[...]    # rsqrt -> EUP slot
    y = (acc - mean) * scale + b_ref[...]
    if add_res:
        y = y + r_ref[...].astype(jnp.float32)
    if relu:
        y = jnp.maximum(y, 0.0)
    o_ref[...] = y.astype(o_ref.dtype)


# ---------------------------------------------------------------------------
# Tiled path, pass 1: GEMM (bf16 x bf16 -> f32 acc) + resident BN stat sums.
# Output y is written back as bf16 (stats come from the f32 accumulator).
# ---------------------------------------------------------------------------
def _gemm_stats_kernel(a_ref, w_ref, y_ref, sum_ref, sq_ref):
    i = pl.program_id(0)

    # sum/sq keep a constant block index across the (arbitrary) M axis, so they
    # stay resident in VMEM and act as cross-grid accumulators.
    @pl.when(i == 0)
    def _():
        sum_ref[...] = jnp.zeros_like(sum_ref)
        sq_ref[...] = jnp.zeros_like(sq_ref)

    acc = jnp.dot(a_ref[...], w_ref[...], preferred_element_type=jnp.float32)
    sum_ref[...] += jnp.sum(acc, axis=0, keepdims=True)
    sq_ref[...] += jnp.sum(acc * acc, axis=0, keepdims=True)
    y_ref[...] = acc.astype(y_ref.dtype)


# ---------------------------------------------------------------------------
# Tiled path, pass 2: BN(train) + affine + optional residual + optional ReLU.
# Pure streaming pass -> large tile, "parallel" grid axis.
# ---------------------------------------------------------------------------
def _bn_act_kernel(*refs, m_real, relu, add_res, eps):
    if add_res:
        y_ref, sum_ref, sq_ref, g_ref, b_ref, r_ref, o_ref = refs
    else:
        y_ref, sum_ref, sq_ref, g_ref, b_ref, o_ref = refs
        r_ref = None

    inv_m = 1.0 / float(m_real)
    mean = sum_ref[...] * inv_m
    var = jnp.maximum(sq_ref[...] * inv_m - mean * mean, 0.0)
    scale = jax.lax.rsqrt(var + eps) * g_ref[...]
    y = (y_ref[...].astype(jnp.float32) - mean) * scale + b_ref[...]
    if add_res:
        y = y + r_ref[...].astype(jnp.float32)
    if relu:
        y = jnp.maximum(y, 0.0)
    o_ref[...] = y.astype(o_ref.dtype)


# ---------------------------------------------------------------------------
# Wrapper: conv (as GEMM) + BN(train) + [residual] + [ReLU]
# ---------------------------------------------------------------------------
def conv_bn(patches, w_mat, gamma, beta, residual=None, relu=False,
            out_dtype=jnp.bfloat16, eps=BN_EPS, force_tiled_tm=None):
    """patches: (M, K), w_mat: (K, Cout) -> padded (M_p, C_p) in out_dtype.

    Padded channels of the result are exactly zero (gamma/beta padding is
    zero); padded rows are garbage and must never be consumed as data.
    """
    M, K = patches.shape
    Cout = w_mat.shape[1]
    K_p = _round_up(K, LANE)
    C_p = _round_lanes(Cout)
    out_bytes = 2 if out_dtype == jnp.bfloat16 else 4
    add_res = residual is not None
    if add_res:
        assert residual.shape[1] == C_p, (residual.shape, C_p)

    def _pad_operands(m_p):
        if (m_p, K_p) != (M, K):
            a = jnp.zeros((m_p, K_p), jnp.bfloat16).at[:M, :K].set(
                patches.astype(jnp.bfloat16))
        else:
            a = patches.astype(jnp.bfloat16)
        if (K_p, C_p) != w_mat.shape:
            w = jnp.zeros((K_p, C_p), jnp.bfloat16).at[:K, :Cout].set(
                w_mat.astype(jnp.bfloat16))
        else:
            w = w_mat.astype(jnp.bfloat16)
        g = jnp.zeros((1, C_p), jnp.float32).at[0, :Cout].set(
            gamma.astype(jnp.float32))
        b = jnp.zeros((1, C_p), jnp.float32).at[0, :Cout].set(
            beta.astype(jnp.float32))
        return a, w, g, b

    # ---- small-M fast path: one pallas_call for the whole conv+BN+act -------
    M16 = _round_up(M, 16)                       # bf16 sublane packing
    fused_bytes = (M16 * K_p * 2 + K_p * C_p * 2
                   + M16 * C_p * (8 + out_bytes)
                   + (M16 * C_p * 2 if add_res else 0))
    use_fused = (force_tiled_tm is None and M16 <= FUSE_M_MAX
                 and fused_bytes <= FUSE_VMEM_BUDGET)

    if use_fused:
        M_p = M16
        a, w, g, b = _pad_operands(M_p)
        inputs = [a, w, g, b]
        in_specs = [pl.BlockSpec((M_p, K_p), lambda i: (0, 0)),
                    pl.BlockSpec((K_p, C_p), lambda i: (0, 0)),
                    pl.BlockSpec((1, C_p), lambda i: (0, 0)),
                    pl.BlockSpec((1, C_p), lambda i: (0, 0))]
        if add_res:
            inputs.append(_match_rows(residual, M_p))
            in_specs.append(pl.BlockSpec((M_p, C_p), lambda i: (0, 0)))
        kernel = functools.partial(_fused_conv_bn_kernel, m_real=M, relu=relu,
                                   add_res=add_res, eps=eps)
        return pl.pallas_call(
            kernel,
            out_shape=jax.ShapeDtypeStruct((M_p, C_p), out_dtype),
            grid=(1,),
            in_specs=in_specs,
            out_specs=pl.BlockSpec((M_p, C_p), lambda i: (0, 0)),
            compiler_params=pltpu.CompilerParams(
                dimension_semantics=("arbitrary",),
                vmem_limit_bytes=VMEM_LIMIT),
        )(*inputs)

    # ---- tiled two-pass path -------------------------------------------------
    TM1 = force_tiled_tm if force_tiled_tm is not None else min(TM1_TARGET, M16)
    TM1 = max(16, TM1 // 16 * 16)
    # pass-2 streaming tile: as large as the VMEM budget allows, multiple of TM1
    per_row = C_p * 2 * (2 + (2 if add_res else 0) + out_bytes)  # x2 dbl-buffer
    cap_rows = max(TM1, PASS2_VMEM_BUDGET // per_row // TM1 * TM1)
    TM2 = min(TM2_TARGET, cap_rows, _round_up(M, TM1))
    TM2 = max(TM1, TM2 // TM1 * TM1)
    M_p = _round_up(M, TM2)
    n1, n2 = M_p // TM1, M_p // TM2

    a, w, g, b = _pad_operands(M_p)

    y, s, sq = pl.pallas_call(
        _gemm_stats_kernel,
        out_shape=(jax.ShapeDtypeStruct((M_p, C_p), jnp.bfloat16),
                   jax.ShapeDtypeStruct((1, C_p), jnp.float32),
                   jax.ShapeDtypeStruct((1, C_p), jnp.float32)),
        grid=(n1,),
        in_specs=[pl.BlockSpec((TM1, K_p), lambda i: (i, 0)),
                  pl.BlockSpec((K_p, C_p), lambda i: (0, 0))],
        out_specs=(pl.BlockSpec((TM1, C_p), lambda i: (i, 0)),
                   pl.BlockSpec((1, C_p), lambda i: (0, 0)),
                   pl.BlockSpec((1, C_p), lambda i: (0, 0))),
        compiler_params=pltpu.CompilerParams(
            dimension_semantics=("arbitrary",),   # resident stat accumulators
            vmem_limit_bytes=VMEM_LIMIT),
    )(a, w)

    inputs = [y, s, sq, g, b]
    in_specs = [pl.BlockSpec((TM2, C_p), lambda i: (i, 0)),
                pl.BlockSpec((1, C_p), lambda i: (0, 0)),
                pl.BlockSpec((1, C_p), lambda i: (0, 0)),
                pl.BlockSpec((1, C_p), lambda i: (0, 0)),
                pl.BlockSpec((1, C_p), lambda i: (0, 0))]
    if add_res:
        inputs.append(_match_rows(residual, M_p))
        in_specs.append(pl.BlockSpec((TM2, C_p), lambda i: (i, 0)))

    kernel = functools.partial(_bn_act_kernel, m_real=M, relu=relu,
                               add_res=add_res, eps=eps)
    return pl.pallas_call(
        kernel,
        out_shape=jax.ShapeDtypeStruct((M_p, C_p), out_dtype),
        grid=(n2,),
        in_specs=in_specs,
        out_specs=pl.BlockSpec((TM2, C_p), lambda i: (i, 0)),
        compiler_params=pltpu.CompilerParams(
            dimension_semantics=("parallel",),    # shards across TCs on v7x
            vmem_limit_bytes=VMEM_LIMIT),
    )(*inputs)


# ---------------------------------------------------------------------------
# Plain-JAX glue: im2col and weight layout
# ---------------------------------------------------------------------------
def im2col(x_nhwc, ksize, stride, pad):
    """x: (N, H, W, C) -> patches (N*Ho*Wo, ksize*ksize*C), plus (N, Ho, Wo).

    Feature order is (ki, kj, c), matching conv_weight_to_mat.
    """
    N, H, W, C = x_nhwc.shape
    xp = jnp.pad(x_nhwc, ((0, 0), (pad, pad), (pad, pad), (0, 0)))
    Ho = (H + 2 * pad - ksize) // stride + 1
    Wo = (W + 2 * pad - ksize) // stride + 1
    cols = []
    for ki in range(ksize):
        for kj in range(ksize):
            cols.append(xp[:, ki:ki + stride * Ho:stride,
                           kj:kj + stride * Wo:stride, :])
    patches = jnp.concatenate(cols, axis=-1)
    return patches.reshape(N * Ho * Wo, ksize * ksize * C), (N, Ho, Wo)


def conv_weight_to_mat(w_oihw, cin_pad=None):
    """PyTorch (Cout, Cin, kh, kw) -> (kh*kw*Cin_p, Cout), matching im2col.

    cin_pad: zero-pad each tap's Cin block to this width (used for conv2 so
    the padded-channel y1 layout can be consumed without slicing).
    """
    Cout, Cin, kh, kw = w_oihw.shape
    w = jnp.transpose(w_oihw, (2, 3, 1, 0))          # (kh, kw, Cin, Cout)
    if cin_pad is not None and cin_pad > Cin:
        w = jnp.pad(w, ((0, 0), (0, 0), (0, cin_pad - Cin), (0, 0)))
    return w.reshape(kh * kw * w.shape[2], Cout)


# ---------------------------------------------------------------------------
# SpecialBlock forward
# ---------------------------------------------------------------------------
def special_block_forward(x_nchw, params, strides, force_tiled_tm=None):
    s0, s1 = strides
    out_ch = params["w1"].shape[0]
    C_p = _round_lanes(out_ch)

    # NHWC, bf16 activations (halves the im2col bytes materialized in HBM)
    x = jnp.transpose(x_nchw, (0, 2, 3, 1)).astype(jnp.bfloat16)

    # identity branch: 1x1 conv (stride s0) + BN  -> padded (M_p, C_p) bf16
    p_id, (N, Ho, Wo) = im2col(x, 1, s0, 0)
    identity = conv_bn(p_id, conv_weight_to_mat(params["w_id"]),
                       params["g_id"], params["b_id"], relu=False,
                       out_dtype=jnp.bfloat16, force_tiled_tm=force_tiled_tm)

    # main branch: conv1 (3x3, stride s0, pad 1) + BN1 + ReLU
    p1, _ = im2col(x, 3, s0, 1)
    y1 = conv_bn(p1, conv_weight_to_mat(params["w1"]),
                 params["g1"], params["b1"], relu=True,
                 out_dtype=jnp.bfloat16, force_tiled_tm=force_tiled_tm)
    M1 = N * Ho * Wo
    # padded channels of y1 are exactly zero -> keep the padded channel layout
    y1_img = y1[:M1].reshape(N, Ho, Wo, C_p)

    # conv2 (3x3, stride s1, pad 1) + BN2 + residual add + ReLU (fused epilogue)
    p2, (N2, Ho2, Wo2) = im2col(y1_img, 3, s1, 1)
    w2 = conv_weight_to_mat(params["w2"], cin_pad=C_p)
    out = conv_bn(p2, w2, params["g2"], params["b2"],
                  residual=identity, relu=True, out_dtype=jnp.float32,
                  force_tiled_tm=force_tiled_tm)

    M2 = N2 * Ho2 * Wo2
    out = out[:M2, :out_ch].reshape(N2, Ho2, Wo2, out_ch)
    return jnp.transpose(out, (0, 3, 1, 2))          # back to NCHW, f32


# ---------------------------------------------------------------------------
# Pure-JAX reference (f32) for correctness check
# ---------------------------------------------------------------------------
def reference_forward(x_nchw, params, strides):
    def conv(x, w, stride, pad):
        return jax.lax.conv_general_dilated(
            x, w, (stride, stride), [(pad, pad), (pad, pad)],
            dimension_numbers=("NCHW", "OIHW", "NCHW"),
            precision=jax.lax.Precision.HIGHEST)

    def bn(x, gamma, beta):
        mean = x.mean(axis=(0, 2, 3), keepdims=True)
        var = ((x - mean) ** 2).mean(axis=(0, 2, 3), keepdims=True)
        return ((x - mean) * jax.lax.rsqrt(var + BN_EPS)
                * gamma.reshape(1, -1, 1, 1) + beta.reshape(1, -1, 1, 1))

    s0, s1 = strides
    identity = bn(conv(x_nchw, params["w_id"], s0, 0),
                  params["g_id"], params["b_id"])
    y = jax.nn.relu(bn(conv(x_nchw, params["w1"], s0, 1),
                       params["g1"], params["b1"]))
    y = bn(conv(y, params["w2"], s1, 1), params["g2"], params["b2"])
    return jax.nn.relu(y + identity)


# ---------------------------------------------------------------------------
def init_params(key, in_ch, out_ch):
    k1, k2, k3 = jax.random.split(key, 3)
    return {
        "w_id": 0.1 * jax.random.normal(k1, (out_ch, in_ch, 1, 1), jnp.float32),
        "w1":   0.1 * jax.random.normal(k2, (out_ch, in_ch, 3, 3), jnp.float32),
        "w2":   0.1 * jax.random.normal(k3, (out_ch, out_ch, 3, 3), jnp.float32),
        # BatchNorm affine params at their PyTorch defaults (weight=1, bias=0)
        "g_id": jnp.ones((out_ch,), jnp.float32),
        "b_id": jnp.zeros((out_ch,), jnp.float32),
        "g1":   jnp.ones((out_ch,), jnp.float32),
        "b1":   jnp.zeros((out_ch,), jnp.float32),
        "g2":   jnp.ones((out_ch,), jnp.float32),
        "b2":   jnp.zeros((out_ch,), jnp.float32),
    }


if __name__ == "__main__":
    key = jax.random.PRNGKey(0)
    kx, kp = jax.random.split(key)

    in_ch, out_ch = 4, 8
    strides = (2, 1)                     # SpecialBlock(in, out, stride=[2, 1])
    x = jax.random.normal(kx, (2, in_ch, 16, 16), jnp.float32)  # NCHW input
    params = init_params(kp, in_ch, out_ch)

    ref = jax.block_until_ready(reference_forward(x, params, strides))

    # Path A: small-M fast path (one fused pallas_call per conv; 3 launches).
    fwd_fused = jax.jit(functools.partial(special_block_forward,
                                          strides=strides))
    out_fused = jax.block_until_ready(fwd_fused(x, params))

    # Path B: force the tiled two-pass path with a tiny tile so the resident
    # stats-accumulator / multi-step pipeline code is also exercised.
    fwd_tiled = jax.jit(functools.partial(special_block_forward,
                                          strides=strides, force_tiled_tm=64))
    out_tiled = jax.block_until_ready(fwd_tiled(x, params))

    assert out_fused.shape == ref.shape == (2, out_ch, 8, 8), out_fused.shape
    assert out_tiled.shape == ref.shape, out_tiled.shape
    # bf16 MXU operands and bf16 intermediate activations (f32 accumulation and
    # BN stats) => bf16-appropriate tolerance vs. the f32 reference.
    for out in (out_fused, out_tiled):
        max_err = float(jnp.max(jnp.abs(out - ref)))
        assert jnp.allclose(out, ref, atol=5e-2, rtol=5e-2), max_err

    print("KERNEL_OK")
</pallas_src>

<mosaic_0001>
module attributes {stable_mosaic.version = 11 : i64} {
  func.func @_fused_conv_bn_kernel(%arg0: i32, %arg1: memref<128x128xbf16, #tpu.memory_space<vmem>>, %arg2: memref<128x128xbf16, #tpu.memory_space<vmem>>, %arg3: memref<1x128xf32, #tpu.memory_space<vmem>>, %arg4: memref<1x128xf32, #tpu.memory_space<vmem>>, %arg5: memref<128x128xbf16, #tpu.memory_space<vmem>>) attributes {dimension_semantics = [#tpu.dimension_semantics<arbitrary>], iteration_bounds = array<i64: 1>, scalar_prefetch = 0 : i64, scratch_operands = 0 : i64, tpu.core_type = #tpu.core_type<tc>, window_params = [{pipeline_mode = #tpu.pipeline_mode<synchronous>, transform_indices = @transform_0, window_bounds = array<i64: 128, 128>}, {pipeline_mode = #tpu.pipeline_mode<synchronous>, transform_indices = @transform_1, window_bounds = array<i64: 128, 128>}, {pipeline_mode = #tpu.pipeline_mode<synchronous>, transform_indices = @transform_2, window_bounds = array<i64: 1, 128>}, {pipeline_mode = #tpu.pipeline_mode<synchronous>, transform_indices = @transform_3, window_bounds = array<i64: 1, 128>}, {pipeline_mode = #tpu.pipeline_mode<synchronous>, transform_indices = @transform_4, window_bounds = array<i64: 128, 128>}]} {
    %c0 = arith.constant 0 : index
    %c0_0 = arith.constant 0 : index
    %0 = vector.load %arg1[%c0, %c0_0] : memref<128x128xbf16, #tpu.memory_space<vmem>>, vector<128x128xbf16>
    %c0_1 = arith.constant 0 : index
    %c0_2 = arith.constant 0 : index
    %1 = vector.load %arg2[%c0_1, %c0_2] : memref<128x128xbf16, #tpu.memory_space<vmem>>, vector<128x128xbf16>
    %cst = arith.constant dense<0.000000e+00> : vector<128x128xf32>
    %2 = tpu.matmul %0, %1, %cst {dimension_numbers = #tpu.dot_dimension_numbers<[1], [0], [0], [1], [0, 0, 1, 1], [], []>} : vector<128x128xbf16>, vector<128x128xbf16>, vector<128x128xf32> -> vector<128x128xf32>
    %cst_3 = arith.constant dense<0.000000e+00> : vector<128xf32>
    %3 = vector.multi_reduction <add>, %2, %cst_3 [0] : vector<128x128xf32> to vector<128xf32>
    %4 = vector.shape_cast %3 : vector<128xf32> to vector<1x128xf32>
    %cst_4 = arith.constant 7.812500e-03 : f32
    %5 = vector.broadcast %cst_4 : f32 to vector<1x128xf32>
    %6 = arith.mulf %4, %5 : vector<1x128xf32>
    %7 = arith.mulf %2, %2 : vector<128x128xf32>
    %cst_5 = arith.constant dense<0.000000e+00> : vector<128xf32>
    %8 = vector.multi_reduction <add>, %7, %cst_5 [0] : vector<128x128xf32> to vector<128xf32>
    %9 = vector.shape_cast %8 : vector<128xf32> to vector<1x128xf32>
    %cst_6 = arith.constant 7.812500e-03 : f32
    %10 = vector.broadcast %cst_6 : f32 to vector<1x128xf32>
    %11 = arith.mulf %9, %10 : vector<1x128xf32>
    %12 = arith.mulf %6, %6 : vector<1x128xf32>
    %13 = arith.subf %11, %12 : vector<1x128xf32>
    %cst_7 = arith.constant 0.000000e+00 : f32
    %14 = vector.broadcast %cst_7 : f32 to vector<1x128xf32>
    %15 = arith.maximumf %13, %14 : vector<1x128xf32>
    %cst_8 = arith.constant 9.99999974E-6 : f32
    %16 = vector.broadcast %cst_8 : f32 to vector<1x128xf32>
    %17 = arith.addf %15, %16 : vector<1x128xf32>
    %18 = math.rsqrt %17 : vector<1x128xf32>
    %c0_9 = arith.constant 0 : index
    %c0_10 = arith.constant 0 : index
    %19 = vector.load %arg3[%c0_9, %c0_10] : memref<1x128xf32, #tpu.memory_space<vmem>>, vector<1x128xf32>
    %20 = arith.mulf %18, %19 : vector<1x128xf32>
    %21 = vector.broadcast %6 : vector<1x128xf32> to vector<128x128xf32>
    %22 = arith.subf %2, %21 : vector<128x128xf32>
    %23 = vector.broadcast %20 : vector<1x128xf32> to vector<128x128xf32>
    %24 = arith.mulf %22, %23 : vector<128x128xf32>
    %c0_11 = arith.constant 0 : index
    %c0_12 = arith.constant 0 : index
    %25 = vector.load %arg4[%c0_11, %c0_12] : memref<1x128xf32, #tpu.memory_space<vmem>>, vector<1x128xf32>
    %26 = vector.broadcast %25 : vector<1x128xf32> to vector<128x128xf32>
    %27 = arith.addf %24, %26 : vector<128x128xf32>
    %cst_13 = arith.constant 0.000000e+00 : f32
    %28 = vector.broadcast %cst_13 : f32 to vector<128x128xf32>
    %29 = arith.maximumf %27, %28 : vector<128x128xf32>
    %30 = arith.truncf %29 : vector<128x128xf32> to vector<128x128xbf16>
    %c0_14 = arith.constant 0 : index
    %c0_15 = arith.constant 0 : index
    %31 = vector.load %arg5[%c0_14, %c0_15] : memref<128x128xbf16, #tpu.memory_space<vmem>>, vector<128x128xbf16>
    tpu.vector_store %arg5[%c0_14, %c0_15], %30 {strides = array<i32>} : memref<128x128xbf16, #tpu.memory_space<vmem>>, vector<128x128xbf16>,
    return
  }
  func.func @transform_0(%arg0: i32) -> (i32, i32) {
    %c0_i32 = arith.constant 0 : i32
    %c0_i32_0 = arith.constant 0 : i32
    %c0_i32_1 = arith.constant 0 : i32
    return %c0_i32, %c0_i32_0 : i32, i32
  }
  func.func @transform_1(%arg0: i32) -> (i32, i32) {
    %c0_i32 = arith.constant 0 : i32
    %c0_i32_0 = arith.constant 0 : i32
    %c0_i32_1 = arith.constant 0 : i32
    return %c0_i32, %c0_i32_0 : i32, i32
  }
  func.func @transform_2(%arg0: i32) -> (i32, i32) {
    %c0_i32 = arith.constant 0 : i32
    %c0_i32_0 = arith.constant 0 : i32
    %c0_i32_1 = arith.constant 0 : i32
    return %c0_i32, %c0_i32_0 : i32, i32
  }
  func.func @transform_3(%arg0: i32) -> (i32, i32) {
    %c0_i32 = arith.constant 0 : i32
    %c0_i32_0 = arith.constant 0 : i32
    %c0_i32_1 = arith.constant 0 : i32
    return %c0_i32, %c0_i32_0 : i32, i32
  }
  func.func @transform_4(%arg0: i32) -> (i32, i32) {
    %c0_i32 = arith.constant 0 : i32
    %c0_i32_0 = arith.constant 0 : i32
    %c0_i32_1 = arith.constant 0 : i32
    return %c0_i32, %c0_i32_0 : i32, i32
  }
}

module attributes {stable_mosaic.version = 11 : i64} {
  func.func @_fused_conv_bn_kernel(%arg0: i32, %arg1: memref<128x128xbf16, #tpu.memory_space<vmem>>, %arg2: memref<128x128xbf16, #tpu.memory_space<vmem>>, %arg3: memref<1x128xf32, #tpu.memory_space<vmem>>, %arg4: memref<1x128xf32, #tpu.memory_space<vmem>>, %arg5: memref<128x128xbf16, #tpu.memory_space<vmem>>) attributes {dimension_semantics = [#tpu.dimension_semantics<arbitrary>], iteration_bounds = array<i64: 1>, scalar_prefetch = 0 : i64, scratch_operands = 0 : i64, tpu.core_type = #tpu.core_type<tc>, window_params = [{pipeline_mode = #tpu.pipeline_mode<synchronous>, transform_indices = @transform_0, window_bounds = array<i64: 128, 128>}, {pipeline_mode = #tpu.pipeline_mode<synchronous>, transform_indices = @transform_1, window_bounds = array<i64: 128, 128>}, {pipeline_mode = #tpu.pipeline_mode<synchronous>, transform_indices = @transform_2, window_bounds = array<i64: 1, 128>}, {pipeline_mode = #tpu.pipeline_mode<synchronous>, transform_indices = @transform_3, window_bounds = array<i64: 1, 128>}, {pipeline_mode = #tpu.pipeline_mode<synchronous>, transform_indices = @transform_4, window_bounds = array<i64: 128, 128>}]} {
    %c0 = arith.constant 0 : index
    %c0_0 = arith.constant 0 : index
    %0 = vector.load %arg1[%c0, %c0_0] : memref<128x128xbf16, #tpu.memory_space<vmem>>, vector<128x128xbf16>
    %c0_1 = arith.constant 0 : index
    %c0_2 = arith.constant 0 : index
    %1 = vector.load %arg2[%c0_1, %c0_2] : memref<128x128xbf16, #tpu.memory_space<vmem>>, vector<128x128xbf16>
    %cst = arith.constant dense<0.000000e+00> : vector<128x128xf32>
    %2 = tpu.matmul %0, %1, %cst {dimension_numbers = #tpu.dot_dimension_numbers<[1], [0], [0], [1], [0, 0, 1, 1], [], []>} : vector<128x128xbf16>, vector<128x128xbf16>, vector<128x128xf32> -> vector<128x128xf32>
    %cst_3 = arith.constant dense<0.000000e+00> : vector<128xf32>
    %3 = vector.multi_reduction <add>, %2, %cst_3 [0] : vector<128x128xf32> to vector<128xf32>
    %4 = vector.shape_cast %3 : vector<128xf32> to vector<1x128xf32>
    %cst_4 = arith.constant 7.812500e-03 : f32
    %5 = vector.broadcast %cst_4 : f32 to vector<1x128xf32>
    %6 = arith.mulf %4, %5 : vector<1x128xf32>
    %7 = arith.mulf %2, %2 : vector<128x128xf32>
    %cst_5 = arith.constant dense<0.000000e+00> : vector<128xf32>
    %8 = vector.multi_reduction <add>, %7, %cst_5 [0] : vector<128x128xf32> to vector<128xf32>
    %9 = vector.shape_cast %8 : vector<128xf32> to vector<1x128xf32>
    %cst_6 = arith.constant 7.812500e-03 : f32
    %10 = vector.broadcast %cst_6 : f32 to vector<1x128xf32>
    %11 = arith.mulf %9, %10 : vector<1x128xf32>
    %12 = arith.mulf %6, %6 : vector<1x128xf32>
    %13 = arith.subf %11, %12 : vector<1x128xf32>
    %cst_7 = arith.constant 0.000000e+00 : f32
    %14 = vector.broadcast %cst_7 : f32 to vector<1x128xf32>
    %15 = arith.maximumf %13, %14 : vector<1x128xf32>
    %cst_8 = arith.constant 9.99999974E-6 : f32
    %16 = vector.broadcast %cst_8 : f32 to vector<1x128xf32>
    %17 = arith.addf %15, %16 : vector<1x128xf32>
    %18 = math.rsqrt %17 : vector<1x128xf32>
    %c0_9 = arith.constant 0 : index
    %c0_10 = arith.constant 0 : index
    %19 = vector.load %arg3[%c0_9, %c0_10] : memref<1x128xf32, #tpu.memory_space<vmem>>, vector<1x128xf32>
    %20 = arith.mulf %18, %19 : vector<1x128xf32>
    %21 = vector.broadcast %6 : vector<1x128xf32> to vector<128x128xf32>
    %22 = arith.subf %2, %21 : vector<128x128xf32>
    %23 = vector.broadcast %20 : vector<1x128xf32> to vector<128x128xf32>
    %24 = arith.mulf %22, %23 : vector<128x128xf32>
    %c0_11 = arith.constant 0 : index
    %c0_12 = arith.constant 0 : index
    %25 = vector.load %arg4[%c0_11, %c0_12] : memref<1x128xf32, #tpu.memory_space<vmem>>, vector<1x128xf32>
    %26 = vector.broadcast %25 : vector<1x128xf32> to vector<128x128xf32>
    %27 = arith.addf %24, %26 : vector<128x128xf32>
    %28 = arith.truncf %27 : vector<128x128xf32> to vector<128x128xbf16>
    %c0_13 = arith.constant 0 : index
    %c0_14 = arith.constant 0 : index
    %29 = vector.load %arg5[%c0_13, %c0_14] : memref<128x128xbf16, #tpu.memory_space<vmem>>, vector<128x128xbf16>
    tpu.vector_store %arg5[%c0_13, %c0_14], %28 {strides = array<i32>} : memref<128x128xbf16, #tpu.memory_space<vmem>>, vector<128x128xbf16>,
    return
  }
  func.func @transform_0(%arg0: i32) -> (i32, i32) {
    %c0_i32 = arith.constant 0 : i32
    %c0_i32_0 = arith.constant 0 : i32
    %c0_i32_1 = arith.constant 0 : i32
    return %c0_i32, %c0_i32_0 : i32, i32
  }
  func.func @transform_1(%arg0: i32) -> (i32, i32) {
    %c0_i32 = arith.constant 0 : i32
    %c0_i32_0 = arith.constant 0 : i32
    %c0_i32_1 = arith.constant 0 : i32
    return %c0_i32, %c0_i32_0 : i32, i32
  }
  func.func @transform_2(%arg0: i32) -> (i32, i32) {
    %c0_i32 = arith.constant 0 : i32
    %c0_i32_0 = arith.constant 0 : i32
    %c0_i32_1 = arith.constant 0 : i32
    return %c0_i32, %c0_i32_0 : i32, i32
  }
  func.func @transform_3(%arg0: i32) -> (i32, i32) {
    %c0_i32 = arith.constant 0 : i32
    %c0_i32_0 = arith.constant 0 : i32
    %c0_i32_1 = arith.constant 0 : i32
    return %c0_i32, %c0_i32_0 : i32, i32
  }
  func.func @transform_4(%arg0: i32) -> (i32, i32) {
    %c0_i32 = arith.constant 0 : i32
    %c0_i32_0 = arith.constant 0 : i32
    %c0_i32_1 = arith.constant 0 : i32
    return %c0_i32, %c0_i32_0 : i32, i32
  }
}

module attributes {stable_mosaic.version = 11 : i64} {
  func.func @_fused_conv_bn_kernel(%arg0: i32, %arg1: memref<128x1152xbf16, #tpu.memory_space<vmem>>, %arg2: memref<1152x128xbf16, #tpu.memory_space<vmem>>, %arg3: memref<1x128xf32, #tpu.memory_space<vmem>>, %arg4: memref<1x128xf32, #tpu.memory_space<vmem>>, %arg5: memref<128x128xbf16, #tpu.memory_space<vmem>>, %arg6: memref<128x128xf32, #tpu.memory_space<vmem>>) attributes {dimension_semantics = [#tpu.dimension_semantics<arbitrary>], iteration_bounds = array<i64: 1>, scalar_prefetch = 0 : i64, scratch_operands = 0 : i64, tpu.core_type = #tpu.core_type<tc>, window_params = [{pipeline_mode = #tpu.pipeline_mode<synchronous>, transform_indices = @transform_0, window_bounds = array<i64: 128, 1152>}, {pipeline_mode = #tpu.pipeline_mode<synchronous>, transform_indices = @transform_1, window_bounds = array<i64: 1152, 128>}, {pipeline_mode = #tpu.pipeline_mode<synchronous>, transform_indices = @transform_2, window_bounds = array<i64: 1, 128>}, {pipeline_mode = #tpu.pipeline_mode<synchronous>, transform_indices = @transform_3, window_bounds = array<i64: 1, 128>}, {pipeline_mode = #tpu.pipeline_mode<synchronous>, transform_indices = @transform_4, window_bounds = array<i64: 128, 128>}, {pipeline_mode = #tpu.pipeline_mode<synchronous>, transform_indices = @transform_5, window_bounds = array<i64: 128, 128>}]} {
    %c0 = arith.constant 0 : index
    %c0_0 = arith.constant 0 : index
    %0 = vector.load %arg1[%c0, %c0_0] : memref<128x1152xbf16, #tpu.memory_space<vmem>>, vector<128x1152xbf16>
    %c0_1 = arith.constant 0 : index
    %c0_2 = arith.constant 0 : index
    %1 = vector.load %arg2[%c0_1, %c0_2] : memref<1152x128xbf16, #tpu.memory_space<vmem>>, vector<1152x128xbf16>
    %cst = arith.constant dense<0.000000e+00> : vector<128x128xf32>
    %2 = tpu.matmul %0, %1, %cst {dimension_numbers = #tpu.dot_dimension_numbers<[1], [0], [0], [1], [0, 0, 1, 1], [], []>} : vector<128x1152xbf16>, vector<1152x128xbf16>, vector<128x128xf32> -> vector<128x128xf32>
    %cst_3 = arith.constant dense<0.000000e+00> : vector<128xf32>
    %3 = vector.multi_reduction <add>, %2, %cst_3 [0] : vector<128x128xf32> to vector<128xf32>
    %4 = vector.shape_cast %3 : vector<128xf32> to vector<1x128xf32>
    %cst_4 = arith.constant 7.812500e-03 : f32
    %5 = vector.broadcast %cst_4 : f32 to vector<1x128xf32>
    %6 = arith.mulf %4, %5 : vector<1x128xf32>
    %7 = arith.mulf %2, %2 : vector<128x128xf32>
    %cst_5 = arith.constant dense<0.000000e+00> : vector<128xf32>
    %8 = vector.multi_reduction <add>, %7, %cst_5 [0] : vector<128x128xf32> to vector<128xf32>
    %9 = vector.shape_cast %8 : vector<128xf32> to vector<1x128xf32>
    %cst_6 = arith.constant 7.812500e-03 : f32
    %10 = vector.broadcast %cst_6 : f32 to vector<1x128xf32>
    %11 = arith.mulf %9, %10 : vector<1x128xf32>
    %12 = arith.mulf %6, %6 : vector<1x128xf32>
    %13 = arith.subf %11, %12 : vector<1x128xf32>
    %cst_7 = arith.constant 0.000000e+00 : f32
    %14 = vector.broadcast %cst_7 : f32 to vector<1x128xf32>
    %15 = arith.maximumf %13, %14 : vector<1x128xf32>
    %cst_8 = arith.constant 9.99999974E-6 : f32
    %16 = vector.broadcast %cst_8 : f32 to vector<1x128xf32>
    %17 = arith.addf %15, %16 : vector<1x128xf32>
    %18 = math.rsqrt %17 : vector<1x128xf32>
    %c0_9 = arith.constant 0 : index
    %c0_10 = arith.constant 0 : index
    %19 = vector.load %arg3[%c0_9, %c0_10] : memref<1x128xf32, #tpu.memory_space<vmem>>, vector<1x128xf32>
    %20 = arith.mulf %18, %19 : vector<1x128xf32>
    %21 = vector.broadcast %6 : vector<1x128xf32> to vector<128x128xf32>
    %22 = arith.subf %2, %21 : vector<128x128xf32>
    %23 = vector.broadcast %20 : vector<1x128xf32> to vector<128x128xf32>
    %24 = arith.mulf %22, %23 : vector<128x128xf32>
    %c0_11 = arith.constant 0 : index
    %c0_12 = arith.constant 0 : index
    %25 = vector.load %arg4[%c0_11, %c0_12] : memref<1x128xf32, #tpu.memory_space<vmem>>, vector<1x128xf32>
    %26 = vector.broadcast %25 : vector<1x128xf32> to vector<128x128xf32>
    %27 = arith.addf %24, %26 : vector<128x128xf32>
    %c0_13 = arith.constant 0 : index
    %c0_14 = arith.constant 0 : index
    %28 = vector.load %arg5[%c0_13, %c0_14] : memref<128x128xbf16, #tpu.memory_space<vmem>>, vector<128x128xbf16>
    %29 = arith.extf %28 : vector<128x128xbf16> to vector<128x128xf32>
    %30 = arith.addf %27, %29 : vector<128x128xf32>
    %cst_15 = arith.constant 0.000000e+00 : f32
    %31 = vector.broadcast %cst_15 : f32 to vector<128x128xf32>
    %32 = arith.maximumf %30, %31 : vector<128x128xf32>
    %c0_16 = arith.constant 0 : index
    %c0_17 = arith.constant 0 : index
    %33 = vector.load %arg6[%c0_16, %c0_17] : memref<128x128xf32, #tpu.memory_space<vmem>>, vector<128x128xf32>
    tpu.vector_store %arg6[%c0_16, %c0_17], %32 {strides = array<i32>} : memref<128x128xf32, #tpu.memory_space<vmem>>, vector<128x128xf32>,
    return
  }
  func.func @transform_0(%arg0: i32) -> (i32, i32) {
    %c0_i32 = arith.constant 0 : i32
    %c0_i32_0 = arith.constant 0 : i32
    %c0_i32_1 = arith.constant 0 : i32
    return %c0_i32, %c0_i32_0 : i32, i32
  }
  func.func @transform_1(%arg0: i32) -> (i32, i32) {
    %c0_i32 = arith.constant 0 : i32
    %c0_i32_0 = arith.constant 0 : i32
    %c0_i32_1 = arith.constant 0 : i32
    return %c0_i32, %c0_i32_0 : i32, i32
  }
  func.func @transform_2(%arg0: i32) -> (i32, i32) {
    %c0_i32 = arith.constant 0 : i32
    %c0_i32_0 = arith.constant 0 : i32
    %c0_i32_1 = arith.constant 0 : i32
    return %c0_i32, %c0_i32_0 : i32, i32
  }
  func.func @transform_3(%arg0: i32) -> (i32, i32) {
    %c0_i32 = arith.constant 0 : i32
    %c0_i32_0 = arith.constant 0 : i32
    %c0_i32_1 = arith.constant 0 : i32
    return %c0_i32, %c0_i32_0 : i32, i32
  }
  func.func @transform_4(%arg0: i32) -> (i32, i32) {
    %c0_i32 = arith.constant 0 : i32
    %c0_i32_0 = arith.constant 0 : i32
    %c0_i32_1 = arith.constant 0 : i32
    return %c0_i32, %c0_i32_0 : i32, i32
  }
  func.func @transform_5(%arg0: i32) -> (i32, i32) {
    %c0_i32 = arith.constant 0 : i32
    %c0_i32_0 = arith.constant 0 : i32
    %c0_i32_1 = arith.constant 0 : i32
    return %c0_i32, %c0_i32_0 : i32, i32
  }
}

</mosaic_0001>

<bundles_post_ra>
// kernel: special_block_forward.4
= control target key start
LH: loop header
LB: loop body
LE: loop exit
PB: predicated region body
PF: predicated region fallthrough
CT: control target
= control target key end

     0   :  { %s728_s1 = inlined_call_operand.vmem [shape: bf16[128,128], index: 1, kind: input, shape index: {}]   ;;  %s729_s0 = inlined_call_operand.vmem [shape: bf16[128,128], index: 0, kind: input, shape index: {}]   ;;  %s730_s3 = inlined_call_operand.vmem [shape: f32[1,128], index: 3, kind: input, shape index: {}]   ;;  %s731_s2 = inlined_call_operand.vmem [shape: f32[1,128], index: 2, kind: input, shape index: {}]   ;;  %s732_s4 = inlined_call_operand.vmem [shape: bf16[128,128], index: 4, kind: output, shape index: {}]  }
   0x1   :  { %v454_v0 = vld [vmem:[%s728_s1 + $0x38] sm:$0xff]  ;;  %v453_v1 = vld [vmem:[%s728_s1 + $0x30] sm:$0xff]  ;;  %v452_v2 = vld [vmem:[%s728_s1 + $0x28] sm:$0xff] }
   0x2   :  { %145 = vmatpush.bf16.msra.mxu0 %v454_v0  ;;  %502 = vmatpush.bf16.msra.mxu1 %v454_v0  ;;  %v451_v3 = vld [vmem:[%s728_s1 + $0x20] sm:$0xff]  ;;  %v450_v4 = vld [vmem:[%s728_s1 + $0x18] sm:$0xff]  ;;  %v449_v5 = vld [vmem:[%s728_s1 + $0x10] sm:$0xff] }
   0x3   :  { %503 = vmatpush.bf16.msra.mxu2 %v454_v0  ;;  %504 = vmatpush.bf16.msra.mxu3 %v454_v0  ;;  %v448_v6 = vld [vmem:[%s728_s1 + $0x8] sm:$0xff]  ;;  %v447_v7 = vld [vmem:[%s728_s1] sm:$0xff]  ;;  %v441_v9 = vld [vmem:[%s729_s0 + $0x10] sm:$0xff] }
   0x4   :  { %v439_v8 = vld [vmem:[%s729_s0] sm:$0xff]  ;;  %v445_v11 = vld [vmem:[%s729_s0 + $0x30] sm:$0xff]  ;;  %v440_v12 = vld [vmem:[%s729_s0 + $0x8] sm:$0xff] }
   0x5   :  { %v443_v10 = vld [vmem:[%s729_s0 + $0x20] sm:$0xff]  ;;  %v442_v13 = vld [vmem:[%s729_s0 + $0x18] sm:$0xff]  ;;  %v444_v14 = vld [vmem:[%s729_s0 + $0x28] sm:$0xff] }
   0x6   :  { %146 = vmatpush.bf16.msra.mxu0 %v453_v1  ;;  %505 = vmatpush.bf16.msra.mxu1 %v453_v1  ;;  %v446_v15 = vld [vmem:[%s729_s0 + $0x38] sm:$0xff] }
   0x7   :  { %506 = vmatpush.bf16.msra.mxu2 %v453_v1  ;;  %507 = vmatpush.bf16.msra.mxu3 %v453_v1 }
   0xa   :  { %147 = vmatpush.bf16.msra.mxu0 %v452_v2  ;;  %508 = vmatpush.bf16.msra.mxu1 %v452_v2 }
   0xb   :  { %509 = vmatpush.bf16.msra.mxu2 %v452_v2  ;;  %510 = vmatpush.bf16.msra.mxu3 %v452_v2 }
   0xe   :  { %148 = vmatpush.bf16.msra.mxu0 %v451_v3  ;;  %511 = vmatpush.bf16.msra.mxu1 %v451_v3 }
   0xf   :  { %512 = vmatpush.bf16.msra.mxu2 %v451_v3  ;;  %513 = vmatpush.bf16.msra.mxu3 %v451_v3 }
  0x12   :  { %149 = vmatpush.bf16.msra.mxu0 %v450_v4  ;;  %514 = vmatpush.bf16.msra.mxu1 %v450_v4 }
  0x13   :  { %515 = vmatpush.bf16.msra.mxu2 %v450_v4  ;;  %516 = vmatpush.bf16.msra.mxu3 %v450_v4 }
  0x16   :  { %150 = vmatpush.bf16.msra.mxu0 %v449_v5  ;;  %517 = vmatpush.bf16.msra.mxu1 %v449_v5 }
  0x17   :  { %518 = vmatpush.bf16.msra.mxu2 %v449_v5  ;;  %519 = vmatpush.bf16.msra.mxu3 %v449_v5 }
  0x1a   :  { %151 = vmatpush.bf16.msra.mxu0 %v448_v6  ;;  %520 = vmatpush.bf16.msra.mxu1 %v448_v6 }
  0x1b   :  { %521 = vmatpush.bf16.msra.mxu2 %v448_v6  ;;  %522 = vmatpush.bf16.msra.mxu3 %v448_v6 }
  0x1e   :  { %152 = vmatpush.bf16.msra.mxu0 %v447_v7  ;;  %523 = vmatpush.bf16.msra.mxu1 %v447_v7 }
  0x1f   :  { %524 = vmatpush.bf16.msra.mxu2 %v447_v7  ;;  %525 = vmatpush.bf16.msra.mxu3 %v447_v7 }
  0x21   :  { %153 = vmatmul.bf16.vlgmr.msra.gmra.mxu0 %v439_v8  ;;  %163 = vmatmul.bf16.vlgmr.msra.gmra.mxu1 %v441_v9 }
  0x22   :  { %173 = vmatmul.bf16.vlgmr.msra.gmra.mxu2 %v443_v10  ;;  %183 = vmatmul.bf16.vlgmr.msra.gmra.mxu3 %v445_v11 }
  0x31   :  { %158 = vmatmul.bf16.gmra.mxu0 %v440_v12  ;;  %168 = vmatmul.bf16.gmra.mxu1 %v442_v13 }
  0x32   :  { %178 = vmatmul.bf16.gmra.mxu2 %v444_v14  ;;  %188 = vmatmul.bf16.gmra.mxu3 %v446_v15 }
  0x9e   :  { %v602_v16 = vpop.f32.mrf.mxu0  ;;  %v604_v17 = vpop.f32.mrf.mxu1 }
  0x9f   :  { %v216_v26 = vmul.f32 %v602_v16, %v602_v16  ;;  %v220_v36 = vmul.f32 %v604_v17, %v604_v17 }
  0xa5   :  { %v608_v19 = vpop.f32.mrf.mxu2  ;;  %v614_v22 = vpop.f32.mrf.mxu3 }
  0xa6   :  { %v606_v18 = vpop.f32.mrf.mxu0  ;;  %v610_v20 = vpop.f32.mrf.mxu1  ;;  %v224_v50 = vmul.f32 %v608_v19, %v608_v19  ;;  %v228_v0 = vmul.f32 %v614_v22, %v614_v22 }
  0xa7   :  { %v217_v24 = vmul.f32 %v606_v18, %v606_v18  ;;  %v194_v27 = vadd.f32 %v606_v18, %v602_v16  ;;  %v221_v40 = vmul.f32 %v610_v20, %v610_v20 }
  0xa9   :  { %v232_v29 = vadd.f32 %v217_v24, %v216_v26 }
  0xad   :  { %v616_v23 = vpop.f32.mrf.mxu2  ;;  %v634_v35 = vpop.f32.mrf.mxu3 }
  0xae   :  { %v612_v21 = vpop.f32.mrf.mxu0  ;;  %v620_v25 = vpop.f32.mrf.mxu1  ;;  %v225_v54 = vmul.f32 %v616_v23, %v616_v23  ;;  %v229_v3 = vmul.f32 %v634_v35, %v634_v35 }
  0xaf   :  { %v218_v28 = vmul.f32 %v612_v21, %v612_v21  ;;  %v195_v30 = vadd.f32 %v194_v27, %v612_v21  ;;  %v222_v44 = vmul.f32 %v620_v25, %v620_v25 }
  0xb1   :  { %v233_v32 = vadd.f32 %v232_v29, %v218_v28 }
  0xb5   :  { %v639_v39 = vpop.f32.mrf.mxu2  ;;  %v655_v53 = vpop.f32.mrf.mxu3 }
  0xb6   :  { %v629_v31 = vpop.f32.mrf.mxu0  ;;  %v644_v43 = vpop.f32.mrf.mxu1  ;;  %v226_v59 = vmul.f32 %v639_v39, %v639_v39  ;;  %v230_v8 = vmul.f32 %v655_v53, %v655_v53 }
  0xb7   :  { %v196_v33 = vadd.f32 %v195_v30, %v629_v31  ;;  %v219_v34 = vmul.f32 %v629_v31, %v629_v31  ;;  %v223_v48 = vmul.f32 %v644_v43, %v644_v43 }
  0xb9   :  { %v197_v37 = vadd.f32 %v196_v33, %v604_v17  ;;  %v234_v38 = vadd.f32 %v233_v32, %v219_v34 }
  0xbb   :  { %v235_v41 = vadd.f32 %v234_v38, %v220_v36  ;;  %v198_v42 = vadd.f32 %v197_v37, %v610_v20 }
  0xbd   :  { %v199_v45 = vadd.f32 %v198_v42, %v620_v25  ;;  %v236_v46 = vadd.f32 %v235_v41, %v221_v40  ;;  %v660_v57 = vpop.f32.mrf.mxu2  ;;  %v674_v6 = vpop.f32.mrf.mxu3 }
  0xbe   :  { %v227_v63 = vmul.f32 %v660_v57, %v660_v57  ;;  %v231_v12 = vmul.f32 %v674_v6, %v674_v6 }
  0xbf   :  { %v200_v47 = vadd.f32 %v199_v45, %v644_v43  ;;  %v237_v49 = vadd.f32 %v236_v46, %v222_v44 }
  0xc1   :  { %v201_v51 = vadd.f32 %v200_v47, %v608_v19  ;;  %v238_v52 = vadd.f32 %v237_v49, %v223_v48 }
  0xc3   :  { %v239_v55 = vadd.f32 %v238_v52, %v224_v50  ;;  %v202_v56 = vadd.f32 %v201_v51, %v616_v23  ;;  %v268_v51 = vld [vmem:[%s731_s2] sm:$0x1] }
  0xc5   :  { %v203_v58 = vadd.f32 %v202_v56, %v639_v39  ;;  %v240_v60 = vadd.f32 %v239_v55, %v225_v54 }
  0xc7   :  { %v241_v61 = vadd.f32 %v240_v60, %v226_v59  ;;  %v204_v62 = vadd.f32 %v203_v58, %v660_v57 }
  0xc9   :  { %v205_v1 = vadd.f32 %v204_v62, %v614_v22  ;;  %v242_v2 = vadd.f32 %v241_v61, %v227_v63 }
  0xcb   :  { %v243_v4 = vadd.f32 %v242_v2, %v228_v0  ;;  %v206_v5 = vadd.f32 %v205_v1, %v634_v35 }
  0xcd   :  { %v207_v7 = vadd.f32 %v206_v5, %v655_v53  ;;  %v244_v9 = vadd.f32 %v243_v4, %v229_v3 }
  0xcf   :  { %v245_v10 = vadd.f32 %v244_v9, %v230_v8  ;;  %v208_v11 = vadd.f32 %v207_v7, %v674_v6 }
  0xd1   :  { %v209_v13 = vrot.slane %v208_v11, 4  ;;  %v246_v14 = vadd.f32 %v245_v10, %v231_v12 }
  0xd3   :  { %v210_v15 = vadd.f32 %v209_v13, %v208_v11  ;;  %v247_v24 = vrot.slane %v246_v14, 4 }
  0xd5   :  { %v211_v26 = vrot.slane %v210_v15, 2  ;;  %v248_v27 = vadd.f32 %v247_v24, %v246_v14 }
  0xd7   :  { %v212_v28 = vadd.f32 %v211_v26, %v210_v15  ;;  %v249_v29 = vrot.slane %v248_v27, 2 }
  0xd9   :  { %v213_v30 = vrot.slane %v212_v28, 1  ;;  %v250_v32 = vadd.f32 %v249_v29, %v248_v27 }
  0xdb   :  { %v214_v33 = vadd.f32 %v213_v30, %v212_v28  ;;  %v251_v34 = vrot.slane %v250_v32, 1 }
  0xdd   :  { %v215_v36 = vmul.f32 0.0078125, %v214_v33  ;;  %v252_v37 = vadd.f32 %v251_v34, %v250_v32 }
  0xdf   :  { %v253_v38 = vmul.f32 0.0078125, %v252_v37  ;;  %v254_v40 = vmul.f32 %v215_v36, %v215_v36  ;;  %v270_v54 = vsub.f32 %v602_v16, %v215_v36  ;;  %v271_v55 = vsub.f32 %v606_v18, %v215_v36 }
  0xe0   :  { %v272_v58 = vsub.f32 %v612_v21, %v215_v36  ;;  %v273_v59 = vsub.f32 %v629_v31, %v215_v36  ;;  %v274_v60 = vsub.f32 %v604_v17, %v215_v36  ;;  %v275_v61 = vsub.f32 %v610_v20, %v215_v36 }
  0xe1   :  { %v255_v41 = vsub.f32 %v253_v38, %v254_v40  ;;  %v276_v62 = vsub.f32 %v620_v25, %v215_v36  ;;  %v277_v63 = vsub.f32 %v644_v43, %v215_v36  ;;  %v278_v0 = vsub.f32 %v608_v19, %v215_v36  ;;  %v526_v19 = vld [vmem:[%s730_s3] ss:$0 sm:$0xff] }
  0xe2   :  { %v279_v1 = vsub.f32 %v616_v23, %v215_v36  ;;  %v280_v16 = vsub.f32 %v639_v39, %v215_v36  ;;  %v281_v18 = vsub.f32 %v660_v57, %v215_v36  ;;  %v282_v21 = vsub.f32 %v614_v22, %v215_v36 }
  0xe3   :  { %v256_v42 = vmax.f32 %v255_v41, 0.0  ;;  %v283_v31 = vsub.f32 %v634_v35, %v215_v36  ;;  %v284_v17 = vsub.f32 %v655_v53, %v215_v36  ;;  %v285_v20 = vsub.f32 %v674_v6, %v215_v36 }
  0xe5   :  { %v257_v44 = vadd.f32 1e-05, %v256_v42 }
  0xe7   :  { %527 = vrsqrt.f32 %v257_v44  ;;  %vm264_vm1 = vweird.f32 %v257_v44 }
  0xed   :  { %v528_v45 = vpop.eup %527 }
  0xee   :  { %v259_v46 = vmul.f32 %v528_v45, %v257_v44  ;;  %vm265_vm0 = vweird.f32 %v528_v45 }
  0xef   :  { %vm266_vm2 = vmor %vm264_vm1, %vm265_vm0 }
  0xf0   :  { %v260_v47 = vmul.f32 %v528_v45, %v259_v46 }
  0xf2   :  { %v261_v48 = vmul.f32 0.5, %v260_v47 }
  0xf4   :  { %v262_v49 = vsub.f32 1.5, %v261_v48 }
  0xf6   :  { %v263_v50 = vmul.f32 %v528_v45, %v262_v49 }
  0xf8   :  { %v267_v52 = vsel %vm266_vm2, %v528_v45, %v263_v50 }
  0xf9   :  { %v269_v56 = vmul.f32 %v268_v51, %v267_v52 }
  0xfb   :  { %v286_v2 = vperm.slane %v269_v56, 0 }
  0xfd   :  { %v287_v25 = vmul.f32 %v286_v2, %v270_v54  ;;  %v288_v3 = vmul.f32 %v286_v2, %v271_v55  ;;  %v289_v43 = vmul.f32 %v286_v2, %v272_v58  ;;  %v290_v4 = vmul.f32 %v286_v2, %v273_v59 }
  0xfe   :  { %v291_v23 = vmul.f32 %v286_v2, %v274_v60  ;;  %v292_v39 = vmul.f32 %v286_v2, %v275_v61  ;;  %v293_v57 = vmul.f32 %v286_v2, %v276_v62  ;;  %v294_v5 = vmul.f32 %v286_v2, %v277_v63 }
  0xff   :  { %v295_v7 = vmul.f32 %v286_v2, %v278_v0  ;;  %v296_v22 = vmul.f32 %v286_v2, %v279_v1  ;;  %v297_v8 = vmul.f32 %v286_v2, %v280_v16  ;;  %v298_v35 = vmul.f32 %v286_v2, %v281_v18 }
 0x100   :  { %v299_v9 = vmul.f32 %v286_v2, %v282_v21  ;;  %v300_v53 = vmul.f32 %v286_v2, %v283_v31  ;;  %v301_v10 = vmul.f32 %v286_v2, %v284_v17  ;;  %v302_v6 = vmul.f32 %v286_v2, %v285_v20 }
 0x101   :  { %v307_v11 = vadd.f32 %v526_v19, %v287_v25  ;;  %v308_v12 = vadd.f32 %v526_v19, %v288_v3  ;;  %v309_v13 = vadd.f32 %v526_v19, %v289_v43  ;;  %v310_v14 = vadd.f32 %v526_v19, %v290_v4 }
 0x102   :  { %v311_v15 = vadd.f32 %v526_v19, %v291_v23  ;;  %v312_v24 = vadd.f32 %v526_v19, %v292_v39  ;;  %v313_v26 = vadd.f32 %v526_v19, %v293_v57  ;;  %v314_v27 = vadd.f32 %v526_v19, %v294_v5 }
 0x103   :  { %v315_v28 = vadd.f32 %v526_v19, %v295_v7  ;;  %v316_v29 = vadd.f32 %v526_v19, %v296_v22  ;;  %v317_v30 = vadd.f32 %v526_v19, %v297_v8  ;;  %v318_v32 = vadd.f32 %v526_v19, %v298_v35 }
 0x104   :  { %v319_v33 = vadd.f32 %v526_v19, %v299_v9  ;;  %v320_v34 = vadd.f32 %v526_v19, %v300_v53  ;;  %v321_v36 = vadd.f32 %v526_v19, %v301_v10  ;;  %v322_v37 = vadd.f32 %v526_v19, %v302_v6 }
 0x105   :  { %v323_v38 = vmax.f32 %v307_v11, 0.0  ;;  %v324_v40 = vmax.f32 %v308_v12, 0.0  ;;  %v325_v41 = vmax.f32 %v309_v13, 0.0  ;;  %v326_v42 = vmax.f32 %v310_v14, 0.0 }
 0x106   :  { %v327_v44 = vmax.f32 %v311_v15, 0.0  ;;  %v328_v45 = vmax.f32 %v312_v24, 0.0  ;;  %v329_v46 = vmax.f32 %v313_v26, 0.0  ;;  %v330_v47 = vmax.f32 %v314_v27, 0.0 }
 0x107   :  { %v331_v48 = vmax.f32 %v315_v28, 0.0  ;;  %v332_v49 = vmax.f32 %v316_v29, 0.0  ;;  %v333_v50 = vmax.f32 %v317_v30, 0.0  ;;  %v334_v51 = vmax.f32 %v318_v32, 0.0 }
 0x108   :  { %v335_v52 = vmax.f32 %v319_v33, 0.0  ;;  %v336_v54 = vmax.f32 %v320_v34, 0.0  ;;  %v337_v55 = vmax.f32 %v321_v36, 0.0  ;;  %v458_v56 = vpack.c.bf16 %v324_v40, %v323_v38 }
 0x109   :  { %v463_v58 = vpack.c.bf16 %v326_v42, %v325_v41  ;;  %v468_v59 = vpack.c.bf16 %v328_v45, %v327_v44  ;;  %v338_v60 = vmax.f32 %v322_v37, 0.0  ;;  %v473_v61 = vpack.c.bf16 %v330_v47, %v329_v46 }
 0x10a   :  { %v478_v62 = vpack.c.bf16 %v332_v49, %v331_v48  ;;  %v488_v63 = vpack.c.bf16 %v336_v54, %v335_v52  ;;  %459 = vst [vmem:[%s732_s4] sm:$0xff] %v458_v56   ;;  %v483_v0 = vpack.c.bf16 %v334_v51, %v333_v50 }
 0x10b   :  { %495 = vst [vmem:[%s732_s4 + $0x8] sm:$0xff] %v463_v58   ;;  %v493_v1 = vpack.c.bf16 %v338_v60, %v337_v55 }
 0x10c   :  { %496 = vst [vmem:[%s732_s4 + $0x10] sm:$0xff] %v468_v59  }
 0x10d   :  { %497 = vst [vmem:[%s732_s4 + $0x18] sm:$0xff] %v473_v61  }
 0x10e   :  { %498 = vst [vmem:[%s732_s4 + $0x20] sm:$0xff] %v478_v62  }
 0x10f   :  { %499 = vst [vmem:[%s732_s4 + $0x28] sm:$0xff] %v483_v0  }
 0x110   :  { %500 = vst [vmem:[%s732_s4 + $0x30] sm:$0xff] %v488_v63  }
 0x111   :  { %501 = vst [vmem:[%s732_s4 + $0x38] sm:$0xff] %v493_v1  }

// kernel: special_block_forward.3
= control target key start
LH: loop header
LB: loop body
LE: loop exit
PB: predicated region body
PF: predicated region fallthrough
CT: control target
= control target key end

     0   :  { %s712_s1 = inlined_call_operand.vmem [shape: bf16[128,128], index: 1, kind: input, shape index: {}]   ;;  %s713_s0 = inlined_call_operand.vmem [shape: bf16[128,128], index: 0, kind: input, shape index: {}]   ;;  %s714_s3 = inlined_call_operand.vmem [shape: f32[1,128], index: 3, kind: input, shape index: {}]   ;;  %s715_s2 = inlined_call_operand.vmem [shape: f32[1,128], index: 2, kind: input, shape index: {}]   ;;  %s716_s4 = inlined_call_operand.vmem [shape: bf16[128,128], index: 4, kind: output, shape index: {}]  }
   0x1   :  { %v438_v0 = vld [vmem:[%s712_s1 + $0x38] sm:$0xff]  ;;  %v437_v1 = vld [vmem:[%s712_s1 + $0x30] sm:$0xff]  ;;  %v436_v2 = vld [vmem:[%s712_s1 + $0x28] sm:$0xff] }
   0x2   :  { %145 = vmatpush.bf16.msra.mxu0 %v438_v0  ;;  %486 = vmatpush.bf16.msra.mxu1 %v438_v0  ;;  %v435_v3 = vld [vmem:[%s712_s1 + $0x20] sm:$0xff]  ;;  %v434_v4 = vld [vmem:[%s712_s1 + $0x18] sm:$0xff]  ;;  %v433_v5 = vld [vmem:[%s712_s1 + $0x10] sm:$0xff] }
   0x3   :  { %487 = vmatpush.bf16.msra.mxu2 %v438_v0  ;;  %488 = vmatpush.bf16.msra.mxu3 %v438_v0  ;;  %v432_v6 = vld [vmem:[%s712_s1 + $0x8] sm:$0xff]  ;;  %v431_v7 = vld [vmem:[%s712_s1] sm:$0xff]  ;;  %v425_v9 = vld [vmem:[%s713_s0 + $0x10] sm:$0xff] }
   0x4   :  { %v423_v8 = vld [vmem:[%s713_s0] sm:$0xff]  ;;  %v429_v11 = vld [vmem:[%s713_s0 + $0x30] sm:$0xff]  ;;  %v424_v12 = vld [vmem:[%s713_s0 + $0x8] sm:$0xff] }
   0x5   :  { %v427_v10 = vld [vmem:[%s713_s0 + $0x20] sm:$0xff]  ;;  %v426_v13 = vld [vmem:[%s713_s0 + $0x18] sm:$0xff]  ;;  %v428_v14 = vld [vmem:[%s713_s0 + $0x28] sm:$0xff] }
   0x6   :  { %146 = vmatpush.bf16.msra.mxu0 %v437_v1  ;;  %489 = vmatpush.bf16.msra.mxu1 %v437_v1  ;;  %v430_v15 = vld [vmem:[%s713_s0 + $0x38] sm:$0xff] }
   0x7   :  { %490 = vmatpush.bf16.msra.mxu2 %v437_v1  ;;  %491 = vmatpush.bf16.msra.mxu3 %v437_v1 }
   0xa   :  { %147 = vmatpush.bf16.msra.mxu0 %v436_v2  ;;  %492 = vmatpush.bf16.msra.mxu1 %v436_v2 }
   0xb   :  { %493 = vmatpush.bf16.msra.mxu2 %v436_v2  ;;  %494 = vmatpush.bf16.msra.mxu3 %v436_v2 }
   0xe   :  { %148 = vmatpush.bf16.msra.mxu0 %v435_v3  ;;  %495 = vmatpush.bf16.msra.mxu1 %v435_v3 }
   0xf   :  { %496 = vmatpush.bf16.msra.mxu2 %v435_v3  ;;  %497 = vmatpush.bf16.msra.mxu3 %v435_v3 }
  0x12   :  { %149 = vmatpush.bf16.msra.mxu0 %v434_v4  ;;  %498 = vmatpush.bf16.msra.mxu1 %v434_v4 }
  0x13   :  { %499 = vmatpush.bf16.msra.mxu2 %v434_v4  ;;  %500 = vmatpush.bf16.msra.mxu3 %v434_v4 }
  0x16   :  { %150 = vmatpush.bf16.msra.mxu0 %v433_v5  ;;  %501 = vmatpush.bf16.msra.mxu1 %v433_v5 }
  0x17   :  { %502 = vmatpush.bf16.msra.mxu2 %v433_v5  ;;  %503 = vmatpush.bf16.msra.mxu3 %v433_v5 }
  0x1a   :  { %151 = vmatpush.bf16.msra.mxu0 %v432_v6  ;;  %504 = vmatpush.bf16.msra.mxu1 %v432_v6 }
  0x1b   :  { %505 = vmatpush.bf16.msra.mxu2 %v432_v6  ;;  %506 = vmatpush.bf16.msra.mxu3 %v432_v6 }
  0x1e   :  { %152 = vmatpush.bf16.msra.mxu0 %v431_v7  ;;  %507 = vmatpush.bf16.msra.mxu1 %v431_v7 }
  0x1f   :  { %508 = vmatpush.bf16.msra.mxu2 %v431_v7  ;;  %509 = vmatpush.bf16.msra.mxu3 %v431_v7 }
  0x21   :  { %153 = vmatmul.bf16.vlgmr.msra.gmra.mxu0 %v423_v8  ;;  %163 = vmatmul.bf16.vlgmr.msra.gmra.mxu1 %v425_v9 }
  0x22   :  { %173 = vmatmul.bf16.vlgmr.msra.gmra.mxu2 %v427_v10  ;;  %183 = vmatmul.bf16.vlgmr.msra.gmra.mxu3 %v429_v11 }
  0x31   :  { %158 = vmatmul.bf16.gmra.mxu0 %v424_v12  ;;  %168 = vmatmul.bf16.gmra.mxu1 %v426_v13 }
  0x32   :  { %178 = vmatmul.bf16.gmra.mxu2 %v428_v14  ;;  %188 = vmatmul.bf16.gmra.mxu3 %v430_v15 }
  0x9e   :  { %v586_v16 = vpop.f32.mrf.mxu0  ;;  %v588_v17 = vpop.f32.mrf.mxu1 }
  0x9f   :  { %v216_v26 = vmul.f32 %v586_v16, %v586_v16  ;;  %v220_v36 = vmul.f32 %v588_v17, %v588_v17 }
  0xa5   :  { %v592_v19 = vpop.f32.mrf.mxu2  ;;  %v598_v22 = vpop.f32.mrf.mxu3 }
  0xa6   :  { %v590_v18 = vpop.f32.mrf.mxu0  ;;  %v594_v20 = vpop.f32.mrf.mxu1  ;;  %v224_v50 = vmul.f32 %v592_v19, %v592_v19  ;;  %v228_v0 = vmul.f32 %v598_v22, %v598_v22 }
  0xa7   :  { %v217_v24 = vmul.f32 %v590_v18, %v590_v18  ;;  %v194_v27 = vadd.f32 %v590_v18, %v586_v16  ;;  %v221_v40 = vmul.f32 %v594_v20, %v594_v20 }
  0xa9   :  { %v232_v29 = vadd.f32 %v217_v24, %v216_v26 }
  0xad   :  { %v600_v23 = vpop.f32.mrf.mxu2  ;;  %v618_v35 = vpop.f32.mrf.mxu3 }
  0xae   :  { %v596_v21 = vpop.f32.mrf.mxu0  ;;  %v604_v25 = vpop.f32.mrf.mxu1  ;;  %v225_v54 = vmul.f32 %v600_v23, %v600_v23  ;;  %v229_v3 = vmul.f32 %v618_v35, %v618_v35 }
  0xaf   :  { %v218_v28 = vmul.f32 %v596_v21, %v596_v21  ;;  %v195_v30 = vadd.f32 %v194_v27, %v596_v21  ;;  %v222_v44 = vmul.f32 %v604_v25, %v604_v25 }
  0xb1   :  { %v233_v32 = vadd.f32 %v232_v29, %v218_v28 }
  0xb5   :  { %v623_v39 = vpop.f32.mrf.mxu2  ;;  %v639_v53 = vpop.f32.mrf.mxu3 }
  0xb6   :  { %v613_v31 = vpop.f32.mrf.mxu0  ;;  %v628_v43 = vpop.f32.mrf.mxu1  ;;  %v226_v59 = vmul.f32 %v623_v39, %v623_v39  ;;  %v230_v8 = vmul.f32 %v639_v53, %v639_v53 }
  0xb7   :  { %v196_v33 = vadd.f32 %v195_v30, %v613_v31  ;;  %v219_v34 = vmul.f32 %v613_v31, %v613_v31  ;;  %v223_v48 = vmul.f32 %v628_v43, %v628_v43 }
  0xb9   :  { %v197_v37 = vadd.f32 %v196_v33, %v588_v17  ;;  %v234_v38 = vadd.f32 %v233_v32, %v219_v34 }
  0xbb   :  { %v235_v41 = vadd.f32 %v234_v38, %v220_v36  ;;  %v198_v42 = vadd.f32 %v197_v37, %v594_v20 }
  0xbd   :  { %v199_v45 = vadd.f32 %v198_v42, %v604_v25  ;;  %v236_v46 = vadd.f32 %v235_v41, %v221_v40  ;;  %v644_v57 = vpop.f32.mrf.mxu2  ;;  %v658_v6 = vpop.f32.mrf.mxu3 }
  0xbe   :  { %v227_v63 = vmul.f32 %v644_v57, %v644_v57  ;;  %v231_v12 = vmul.f32 %v658_v6, %v658_v6 }
  0xbf   :  { %v200_v47 = vadd.f32 %v199_v45, %v628_v43  ;;  %v237_v49 = vadd.f32 %v236_v46, %v222_v44 }
  0xc1   :  { %v201_v51 = vadd.f32 %v200_v47, %v592_v19  ;;  %v238_v52 = vadd.f32 %v237_v49, %v223_v48 }
  0xc3   :  { %v239_v55 = vadd.f32 %v238_v52, %v224_v50  ;;  %v202_v56 = vadd.f32 %v201_v51, %v600_v23  ;;  %v268_v51 = vld [vmem:[%s715_s2] sm:$0x1] }
  0xc5   :  { %v203_v58 = vadd.f32 %v202_v56, %v623_v39  ;;  %v240_v60 = vadd.f32 %v239_v55, %v225_v54 }
  0xc7   :  { %v241_v61 = vadd.f32 %v240_v60, %v226_v59  ;;  %v204_v62 = vadd.f32 %v203_v58, %v644_v57 }
  0xc9   :  { %v205_v1 = vadd.f32 %v204_v62, %v598_v22  ;;  %v242_v2 = vadd.f32 %v241_v61, %v227_v63 }
  0xcb   :  { %v243_v4 = vadd.f32 %v242_v2, %v228_v0  ;;  %v206_v5 = vadd.f32 %v205_v1, %v618_v35 }
  0xcd   :  { %v207_v7 = vadd.f32 %v206_v5, %v639_v53  ;;  %v244_v9 = vadd.f32 %v243_v4, %v229_v3 }
  0xcf   :  { %v245_v10 = vadd.f32 %v244_v9, %v230_v8  ;;  %v208_v11 = vadd.f32 %v207_v7, %v658_v6 }
  0xd1   :  { %v209_v13 = vrot.slane %v208_v11, 4  ;;  %v246_v14 = vadd.f32 %v245_v10, %v231_v12 }
  0xd3   :  { %v210_v15 = vadd.f32 %v209_v13, %v208_v11  ;;  %v247_v24 = vrot.slane %v246_v14, 4 }
  0xd5   :  { %v211_v26 = vrot.slane %v210_v15, 2  ;;  %v248_v27 = vadd.f32 %v247_v24, %v246_v14 }
  0xd7   :  { %v212_v28 = vadd.f32 %v211_v26, %v210_v15  ;;  %v249_v29 = vrot.slane %v248_v27, 2 }
  0xd9   :  { %v213_v30 = vrot.slane %v212_v28, 1  ;;  %v250_v32 = vadd.f32 %v249_v29, %v248_v27 }
  0xdb   :  { %v214_v33 = vadd.f32 %v213_v30, %v212_v28  ;;  %v251_v34 = vrot.slane %v250_v32, 1 }
  0xdd   :  { %v215_v36 = vmul.f32 0.0078125, %v214_v33  ;;  %v252_v37 = vadd.f32 %v251_v34, %v250_v32 }
  0xdf   :  { %v253_v38 = vmul.f32 0.0078125, %v252_v37  ;;  %v254_v40 = vmul.f32 %v215_v36, %v215_v36  ;;  %v270_v54 = vsub.f32 %v586_v16, %v215_v36  ;;  %v271_v55 = vsub.f32 %v590_v18, %v215_v36 }
  0xe0   :  { %v272_v58 = vsub.f32 %v596_v21, %v215_v36  ;;  %v273_v59 = vsub.f32 %v613_v31, %v215_v36  ;;  %v274_v60 = vsub.f32 %v588_v17, %v215_v36  ;;  %v275_v61 = vsub.f32 %v594_v20, %v215_v36 }
  0xe1   :  { %v255_v41 = vsub.f32 %v253_v38, %v254_v40  ;;  %v276_v62 = vsub.f32 %v604_v25, %v215_v36  ;;  %v277_v63 = vsub.f32 %v628_v43, %v215_v36  ;;  %v278_v0 = vsub.f32 %v592_v19, %v215_v36  ;;  %v510_v19 = vld [vmem:[%s714_s3] ss:$0 sm:$0xff] }
  0xe2   :  { %v279_v1 = vsub.f32 %v600_v23, %v215_v36  ;;  %v280_v16 = vsub.f32 %v623_v39, %v215_v36  ;;  %v281_v18 = vsub.f32 %v644_v57, %v215_v36  ;;  %v282_v21 = vsub.f32 %v598_v22, %v215_v36 }
  0xe3   :  { %v256_v42 = vmax.f32 %v255_v41, 0.0  ;;  %v283_v31 = vsub.f32 %v618_v35, %v215_v36  ;;  %v284_v17 = vsub.f32 %v639_v53, %v215_v36  ;;  %v285_v20 = vsub.f32 %v658_v6, %v215_v36 }
  0xe5   :  { %v257_v44 = vadd.f32 1e-05, %v256_v42 }
  0xe7   :  { %511 = vrsqrt.f32 %v257_v44  ;;  %vm264_vm1 = vweird.f32 %v257_v44 }
  0xed   :  { %v512_v45 = vpop.eup %511 }
  0xee   :  { %v259_v46 = vmul.f32 %v512_v45, %v257_v44  ;;  %vm265_vm0 = vweird.f32 %v512_v45 }
  0xef   :  { %vm266_vm2 = vmor %vm264_vm1, %vm265_vm0 }
  0xf0   :  { %v260_v47 = vmul.f32 %v512_v45, %v259_v46 }
  0xf2   :  { %v261_v48 = vmul.f32 0.5, %v260_v47 }
  0xf4   :  { %v262_v49 = vsub.f32 1.5, %v261_v48 }
  0xf6   :  { %v263_v50 = vmul.f32 %v512_v45, %v262_v49 }
  0xf8   :  { %v267_v52 = vsel %vm266_vm2, %v512_v45, %v263_v50 }
  0xf9   :  { %v269_v56 = vmul.f32 %v268_v51, %v267_v52 }
  0xfb   :  { %v286_v2 = vperm.slane %v269_v56, 0 }
  0xfd   :  { %v287_v25 = vmul.f32 %v286_v2, %v270_v54  ;;  %v288_v3 = vmul.f32 %v286_v2, %v271_v55  ;;  %v289_v43 = vmul.f32 %v286_v2, %v272_v58  ;;  %v290_v4 = vmul.f32 %v286_v2, %v273_v59 }
  0xfe   :  { %v291_v23 = vmul.f32 %v286_v2, %v274_v60  ;;  %v292_v39 = vmul.f32 %v286_v2, %v275_v61  ;;  %v293_v57 = vmul.f32 %v286_v2, %v276_v62  ;;  %v294_v5 = vmul.f32 %v286_v2, %v277_v63 }
  0xff   :  { %v295_v7 = vmul.f32 %v286_v2, %v278_v0  ;;  %v296_v22 = vmul.f32 %v286_v2, %v279_v1  ;;  %v297_v8 = vmul.f32 %v286_v2, %v280_v16  ;;  %v298_v35 = vmul.f32 %v286_v2, %v281_v18 }
 0x100   :  { %v299_v9 = vmul.f32 %v286_v2, %v282_v21  ;;  %v300_v53 = vmul.f32 %v286_v2, %v283_v31  ;;  %v301_v10 = vmul.f32 %v286_v2, %v284_v17  ;;  %v302_v6 = vmul.f32 %v286_v2, %v285_v20 }
 0x101   :  { %v307_v11 = vadd.f32 %v510_v19, %v287_v25  ;;  %v308_v12 = vadd.f32 %v510_v19, %v288_v3  ;;  %v309_v13 = vadd.f32 %v510_v19, %v289_v43  ;;  %v310_v14 = vadd.f32 %v510_v19, %v290_v4 }
 0x102   :  { %v311_v15 = vadd.f32 %v510_v19, %v291_v23  ;;  %v312_v24 = vadd.f32 %v510_v19, %v292_v39  ;;  %v313_v26 = vadd.f32 %v510_v19, %v293_v57  ;;  %v314_v27 = vadd.f32 %v510_v19, %v294_v5 }
 0x103   :  { %v315_v28 = vadd.f32 %v510_v19, %v295_v7  ;;  %v316_v29 = vadd.f32 %v510_v19, %v296_v22  ;;  %v317_v30 = vadd.f32 %v510_v19, %v297_v8  ;;  %v318_v32 = vadd.f32 %v510_v19, %v298_v35 }
 0x104   :  { %v319_v33 = vadd.f32 %v510_v19, %v299_v9  ;;  %v320_v34 = vadd.f32 %v510_v19, %v300_v53  ;;  %v321_v36 = vadd.f32 %v510_v19, %v301_v10  ;;  %v442_v37 = vpack.c.bf16 %v308_v12, %v307_v11 }
 0x105   :  { %v447_v38 = vpack.c.bf16 %v310_v14, %v309_v13  ;;  %v452_v40 = vpack.c.bf16 %v312_v24, %v311_v15  ;;  %v322_v41 = vadd.f32 %v510_v19, %v302_v6  ;;  %v457_v42 = vpack.c.bf16 %v314_v27, %v313_v26 }
 0x106   :  { %v462_v44 = vpack.c.bf16 %v316_v29, %v315_v28  ;;  %v472_v45 = vpack.c.bf16 %v320_v34, %v319_v33  ;;  %443 = vst [vmem:[%s716_s4] sm:$0xff] %v442_v37   ;;  %v467_v46 = vpack.c.bf16 %v318_v32, %v317_v30 }
 0x107   :  { %479 = vst [vmem:[%s716_s4 + $0x8] sm:$0xff] %v447_v38   ;;  %v477_v47 = vpack.c.bf16 %v322_v41, %v321_v36 }
 0x108   :  { %480 = vst [vmem:[%s716_s4 + $0x10] sm:$0xff] %v452_v40  }
 0x109   :  { %481 = vst [vmem:[%s716_s4 + $0x18] sm:$0xff] %v457_v42  }
 0x10a   :  { %482 = vst [vmem:[%s716_s4 + $0x20] sm:$0xff] %v462_v44  }
 0x10b   :  { %483 = vst [vmem:[%s716_s4 + $0x28] sm:$0xff] %v467_v46  }
 0x10c   :  { %484 = vst [vmem:[%s716_s4 + $0x30] sm:$0xff] %v472_v45  }
 0x10d   :  { %485 = vst [vmem:[%s716_s4 + $0x38] sm:$0xff] %v477_v47  }

// kernel: special_block_forward.5
= control target key start
LH: loop header
LB: loop body
LE: loop exit
PB: predicated region body
PF: predicated region fallthrough
CT: control target
= control target key end

     0   :  { %s3438_s1 = inlined_call_operand.vmem [shape: bf16[1152,128], index: 1, kind: input, shape index: {}]   ;;  %s3439_s0 = inlined_call_operand.vmem [shape: bf16[128,1152], index: 0, kind: input, shape index: {}]   ;;  %s3440_s3 = inlined_call_operand.vmem [shape: f32[1,128], index: 3, kind: input, shape index: {}]   ;;  %s3441_s2 = inlined_call_operand.vmem [shape: f32[1,128], index: 2, kind: input, shape index: {}]   ;;  %s3442_s4 = inlined_call_operand.vmem [shape: bf16[128,128], index: 4, kind: input, shape index: {}]   ;;  %s3443_s5 = inlined_call_operand.vmem [shape: f32[128,128], index: 5, kind: output, shape index: {}]  }
   0x1   :  { %v2353_v0 = vld [vmem:[%s3438_s1 + $0x38] sm:$0xff]  ;;  %v2352_v1 = vld [vmem:[%s3438_s1 + $0x30] sm:$0xff]  ;;  %v2351_v2 = vld [vmem:[%s3438_s1 + $0x28] sm:$0xff] }
   0x2   :  { %2457 = vmatpush.bf16.msra.mxu1 %v2353_v0  ;;  %2458 = vmatpush.bf16.msra.mxu2 %v2353_v0  ;;  %v2350_v3 = vld [vmem:[%s3438_s1 + $0x20] sm:$0xff]  ;;  %v2349_v4 = vld [vmem:[%s3438_s1 + $0x18] sm:$0xff]  ;;  %v2348_v5 = vld [vmem:[%s3438_s1 + $0x10] sm:$0xff] }
   0x3   :  { %2459 = vmatpush.bf16.msra.mxu3 %v2353_v0  ;;  %1044 = vmatpush.bf16.msra.mxu0 %v2353_v0  ;;  %v2347_v6 = vld [vmem:[%s3438_s1 + $0x8] sm:$0xff]  ;;  %v2346_v7 = vld [vmem:[%s3438_s1] sm:$0xff]  ;;  %v1772_v8 = vld [vmem:[%s3439_s0 + $0x90] sm:$0xf] }
   0x4   :  { %v2296_v9 = vld [vmem:[%s3439_s0 + $0xb0] sm:$0xf0]  ;;  %v1844_v10 = vld [vmem:[%s3439_s0 + $0x120] sm:$0xf]  ;;  %v2314_v11 = vld [vmem:[%s3439_s0 + $0x140] sm:$0xf0] }
   0x5   :  { %v1916_v12 = vld [vmem:[%s3439_s0 + $0x1b0] sm:$0xf]  ;;  %v2332_v13 = vld [vmem:[%s3439_s0 + $0x1d0] sm:$0xf0]  ;;  %v1700_v14 = vld [vmem:[%s3439_s0] sm:$0xf]  ;;  %v1773_v18 = vor.u32 %v2296_v9, %v1772_v8  ;;  %v1845_v19 = vor.u32 %v2314_v11, %v1844_v10 }
   0x6   :  { %2460 = vmatpush.bf16.msra.mxu1 %v2352_v1  ;;  %2461 = vmatpush.bf16.msra.mxu2 %v2352_v1  ;;  %v2278_v15 = vld [vmem:[%s3439_s0 + $0x20] sm:$0xf0]  ;;  %v2369_v16 = vld [vmem:[%s3438_s1 + $0xb8] sm:$0xff]  ;;  %v1917_v20 = vor.u32 %v2332_v13, %v1916_v12  ;;  %v2368_v24 = vld [vmem:[%s3438_s1 + $0xb0] sm:$0xff] }
   0x7   :  { %2462 = vmatpush.bf16.msra.mxu3 %v2352_v1  ;;  %1045 = vmatpush.bf16.msra.mxu0 %v2352_v1  ;;  %v2361_v17 = vld [vmem:[%s3438_s1 + $0x78] sm:$0xff]  ;;  %v1701_v21 = vor.u32 %v2278_v15, %v1700_v14  ;;  %v2360_v25 = vld [vmem:[%s3438_s1 + $0x70] sm:$0xff]  ;;  %v2367_v28 = vld [vmem:[%s3438_s1 + $0xa8] sm:$0xff] }
   0x8   :  { %v2377_v22 = vld [vmem:[%s3438_s1 + $0xf8] sm:$0xff]  ;;  %v2376_v26 = vld [vmem:[%s3438_s1 + $0xf0] sm:$0xff]  ;;  %v2359_v29 = vld [vmem:[%s3438_s1 + $0x68] sm:$0xff] }
   0x9   :  { %v2385_v23 = vld [vmem:[%s3438_s1 + $0x138] sm:$0xff]  ;;  %v2384_v27 = vld [vmem:[%s3438_s1 + $0x130] sm:$0xff]  ;;  %v2375_v30 = vld [vmem:[%s3438_s1 + $0xe8] sm:$0xff] }
   0xa   :  { %2463 = vmatpush.bf16.msra.mxu1 %v2351_v2  ;;  %2464 = vmatpush.bf16.msra.mxu2 %v2351_v2  ;;  %v2383_v31 = vld [vmem:[%s3438_s1 + $0x128] sm:$0xff]  ;;  %v2366_v32 = vld [vmem:[%s3438_s1 + $0xa0] sm:$0xff]  ;;  %v1808_v36 = vld [vmem:[%s3439_s0 + $0xd8] sm:$0xf] }
   0xb   :  { %2465 = vmatpush.bf16.msra.mxu3 %v2351_v2  ;;  %1046 = vmatpush.bf16.msra.mxu0 %v2351_v2  ;;  %v2358_v33 = vld [vmem:[%s3438_s1 + $0x60] sm:$0xff]  ;;  %v2305_v37 = vld [vmem:[%s3439_s0 + $0xf8] sm:$0xf0]  ;;  %v1880_v38 = vld [vmem:[%s3439_s0 + $0x168] sm:$0xf] }
   0xc   :  { %v2374_v34 = vld [vmem:[%s3438_s1 + $0xe0] sm:$0xff]  ;;  %v2323_v39 = vld [vmem:[%s3439_s0 + $0x188] sm:$0xf0]  ;;  %v1952_v40 = vld [vmem:[%s3439_s0 + $0x1f8] sm:$0xf]  ;;  %v1809_v46 = vor.u32 %v2305_v37, %v1808_v36 }
   0xd   :  { %v2382_v35 = vld [vmem:[%s3438_s1 + $0x120] sm:$0xff]  ;;  %v2341_v41 = vld [vmem:[%s3439_s0 + $0x218] sm:$0xf0]  ;;  %v1736_v42 = vld [vmem:[%s3439_s0 + $0x48] sm:$0xf]  ;;  %v1881_v47 = vor.u32 %v2323_v39, %v1880_v38 }
   0xe   :  { %2466 = vmatpush.bf16.msra.mxu1 %v2350_v3  ;;  %2467 = vmatpush.bf16.msra.mxu2 %v2350_v3  ;;  %v2287_v43 = vld [vmem:[%s3439_s0 + $0x68] sm:$0xf0]  ;;  %v2365_v44 = vld [vmem:[%s3438_s1 + $0x98] sm:$0xff]  ;;  %v1953_v48 = vor.u32 %v2341_v41, %v1952_v40  ;;  %v2364_v52 = vld [vmem:[%s3438_s1 + $0x90] sm:$0xff] }
   0xf   :  { %2468 = vmatpush.bf16.msra.mxu3 %v2350_v3  ;;  %1047 = vmatpush.bf16.msra.mxu0 %v2350_v3  ;;  %v2357_v45 = vld [vmem:[%s3438_s1 + $0x58] sm:$0xff]  ;;  %v1737_v49 = vor.u32 %v2287_v43, %v1736_v42  ;;  %v2356_v53 = vld [vmem:[%s3438_s1 + $0x50] sm:$0xff]  ;;  %v2363_v56 = vld [vmem:[%s3438_s1 + $0x88] sm:$0xff] }
  0x10   :  { %v2373_v50 = vld [vmem:[%s3438_s1 + $0xd8] sm:$0xff]  ;;  %v2372_v54 = vld [vmem:[%s3438_s1 + $0xd0] sm:$0xff]  ;;  %v2355_v57 = vld [vmem:[%s3438_s1 + $0x48] sm:$0xff] }
  0x11   :  { %v2381_v51 = vld [vmem:[%s3438_s1 + $0x118] sm:$0xff]  ;;  %v2380_v55 = vld [vmem:[%s3438_s1 + $0x110] sm:$0xff]  ;;  %v2371_v58 = vld [vmem:[%s3438_s1 + $0xc8] sm:$0xff] }
  0x12   :  { %2469 = vmatpush.bf16.msra.mxu1 %v2349_v4  ;;  %2470 = vmatpush.bf16.msra.mxu2 %v2349_v4  ;;  %v2379_v59 = vld [vmem:[%s3438_s1 + $0x108] sm:$0xff]  ;;  %v2362_v60 = vld [vmem:[%s3438_s1 + $0x80] sm:$0xff]  ;;  %v2401_v2 = vld [vmem:[%s3438_s1 + $0x1b8] sm:$0xff] }
  0x13   :  { %2471 = vmatpush.bf16.msra.mxu3 %v2349_v4  ;;  %1048 = vmatpush.bf16.msra.mxu0 %v2349_v4  ;;  %v2354_v61 = vld [vmem:[%s3438_s1 + $0x40] sm:$0xff]  ;;  %v1702_v1 = vld [vmem:[%s3439_s0 + $0x24] sm:$0xf0]  ;;  %v2393_v3 = vld [vmem:[%s3438_s1 + $0x178] sm:$0xff] }
  0x14   :  { %v2274_v62 = vld [vmem:[%s3439_s0 + $0x4] sm:$0xf]  ;;  %v1708_v4 = vld [vmem:[%s3439_s0 + $0x8] sm:$0xf]  ;;  %v1716_v8 = vld [vmem:[%s3439_s0 + $0x10] sm:$0xf] }
  0x15   :  { %v2370_v63 = vld [vmem:[%s3438_s1 + $0xc0] sm:$0xff]  ;;  %v2280_v9 = vld [vmem:[%s3439_s0 + $0x30] sm:$0xf0]  ;;  %v2409_v10 = vld [vmem:[%s3438_s1 + $0x1f8] sm:$0xff]  ;;  %v1705_v12 = vor.u32 %v2274_v62, %v1702_v1 }
  0x16   :  { %2472 = vmatpush.bf16.msra.mxu1 %v2348_v5  ;;  %2473 = vmatpush.bf16.msra.mxu2 %v2348_v5  ;;  %v2378_v0 = vld [vmem:[%s3438_s1 + $0x100] sm:$0xff]  ;;  %v2417_v11 = vld [vmem:[%s3438_s1 + $0x238] sm:$0xff]  ;;  %v1717_v15 = vor.u32 %v2280_v9, %v1716_v8  ;;  %v2292_v40 = vld [vmem:[%s3439_s0 + $0x94] sm:$0xf] }
  0x17   :  { %2474 = vmatpush.bf16.msra.mxu3 %v2348_v5  ;;  %1049 = vmatpush.bf16.msra.mxu0 %v2348_v5  ;;  %v2279_v5 = vld [vmem:[%s3439_s0 + $0x28] sm:$0xf0]  ;;  %v2398_v36 = vld [vmem:[%s3438_s1 + $0x1a0] sm:$0xff]  ;;  %v1774_v41 = vld [vmem:[%s3439_s0 + $0xb4] sm:$0xf0] }
  0x18   :  { %v1709_v13 = vor.u32 %v2279_v5, %v1708_v4  ;;  %v2406_v37 = vld [vmem:[%s3438_s1 + $0x1e0] sm:$0xff]  ;;  %v1780_v42 = vld [vmem:[%s3439_s0 + $0x98] sm:$0xf]  ;;  %v2297_v43 = vld [vmem:[%s3439_s0 + $0xb8] sm:$0xf0] }
  0x19   :  { %v2390_v38 = vld [vmem:[%s3438_s1 + $0x160] sm:$0xff]  ;;  %v1824_v62 = vld [vmem:[%s3439_s0 + $0xe8] sm:$0xf]  ;;  %v2396_v4 = vld [vmem:[%s3438_s1 + $0x190] sm:$0xff] }
  0x1a   :  { %2475 = vmatpush.bf16.msra.mxu1 %v2347_v6  ;;  %2476 = vmatpush.bf16.msra.mxu2 %v2347_v6  ;;  %v2414_v39 = vld [vmem:[%s3438_s1 + $0x220] sm:$0xff]  ;;  %v2404_v5 = vld [vmem:[%s3438_s1 + $0x1d0] sm:$0xff]  ;;  %v1846_v9 = vld [vmem:[%s3439_s0 + $0x144] sm:$0xf0] }
  0x1b   :  { %2477 = vmatpush.bf16.msra.mxu3 %v2347_v6  ;;  %1050 = vmatpush.bf16.msra.mxu0 %v2347_v6  ;;  %v2275_v6 = vld [vmem:[%s3439_s0 + $0xc] sm:$0xf]  ;;  %v2310_v8 = vld [vmem:[%s3439_s0 + $0x124] sm:$0xf] }
  0x1e   :  { %2478 = vmatpush.bf16.msra.mxu1 %v2346_v7  ;;  %2479 = vmatpush.bf16.msra.mxu2 %v2346_v7 }
  0x1f   :  { %2480 = vmatpush.bf16.msra.mxu3 %v2346_v7  ;;  %1051 = vmatpush.bf16.msra.mxu0 %v2346_v7  ;;  %v1710_v7 = vld [vmem:[%s3439_s0 + $0x2c] sm:$0xf0] }
  0x20   :  { %v1713_v14 = vor.u32 %v2275_v6, %v1710_v7  ;;  %v2388_v6 = vld [vmem:[%s3438_s1 + $0x150] sm:$0xff] }
  0x21   :  { %1062 = vmatmul.bf16.vlgmr.msra.gmra.mxu1 %v1773_v18  ;;  %1072 = vmatmul.bf16.vlgmr.msra.gmra.mxu2 %v1845_v19  ;;  %v2408_v18 = vld [vmem:[%s3438_s1 + $0x1f0] sm:$0xff] }
  0x22   :  { %1142 = vmatpush.bf16.msrb.mxu2 %v2369_v16  ;;  %1093 = vmatpush.bf16.msrb.mxu1 %v2361_v17  ;;  %v2400_v16 = vld [vmem:[%s3438_s1 + $0x1b0] sm:$0xff] }
  0x23   :  { %1082 = vmatmul.bf16.vlgmr.msra.gmra.mxu3 %v1917_v20  ;;  %1052 = vmatmul.bf16.vlgmr.msra.gmra.mxu0 %v1701_v21  ;;  %v2392_v17 = vld [vmem:[%s3438_s1 + $0x170] sm:$0xff]  ;;  %v2399_v20 = vld [vmem:[%s3438_s1 + $0x1a8] sm:$0xff] }
  0x24   :  { %1191 = vmatpush.bf16.msrb.mxu3 %v2377_v22  ;;  %1240 = vmatpush.bf16.msrb.mxu0 %v2385_v23  ;;  %v2416_v19 = vld [vmem:[%s3438_s1 + $0x230] sm:$0xff]  ;;  %v2391_v21 = vld [vmem:[%s3438_s1 + $0x168] sm:$0xff] }
  0x25   :  { %v2407_v22 = vld [vmem:[%s3438_s1 + $0x1e8] sm:$0xff]  ;;  %v2412_v7 = vld [vmem:[%s3438_s1 + $0x210] sm:$0xff] }
  0x26   :  { %1143 = vmatpush.bf16.msrb.mxu2 %v2368_v24  ;;  %1094 = vmatpush.bf16.msrb.mxu1 %v2360_v25  ;;  %v2415_v23 = vld [vmem:[%s3438_s1 + $0x228] sm:$0xff]  ;;  %v1738_v25 = vld [vmem:[%s3439_s0 + $0x6c] sm:$0xf0] }
  0x27   :  { %v2283_v24 = vld [vmem:[%s3439_s0 + $0x4c] sm:$0xf] }
  0x28   :  { %1192 = vmatpush.bf16.msrb.mxu3 %v2376_v26  ;;  %1241 = vmatpush.bf16.msrb.mxu0 %v2384_v27  ;;  %v1744_v26 = vld [vmem:[%s3439_s0 + $0x50] sm:$0xf]  ;;  %v2288_v27 = vld [vmem:[%s3439_s0 + $0x70] sm:$0xf0] }
  0x2a   :  { %1144 = vmatpush.bf16.msrb.mxu2 %v2367_v28  ;;  %1095 = vmatpush.bf16.msrb.mxu1 %v2359_v29  ;;  %v2284_v28 = vld [vmem:[%s3439_s0 + $0x54] sm:$0xf]  ;;  %v1746_v29 = vld [vmem:[%s3439_s0 + $0x74] sm:$0xf0] }
  0x2c   :  { %1193 = vmatpush.bf16.msrb.mxu3 %v2375_v30  ;;  %1242 = vmatpush.bf16.msrb.mxu0 %v2383_v31  ;;  %v1752_v30 = vld [vmem:[%s3439_s0 + $0x58] sm:$0xf]  ;;  %v2289_v31 = vld [vmem:[%s3439_s0 + $0x78] sm:$0xf0] }
  0x2e   :  { %1145 = vmatpush.bf16.msrb.mxu2 %v2366_v32  ;;  %1096 = vmatpush.bf16.msrb.mxu1 %v2358_v33  ;;  %v1741_v32 = vor.u32 %v2283_v24, %v1738_v25  ;;  %v1745_v33 = vor.u32 %v2288_v27, %v1744_v26  ;;  %v2319_v24 = vld [vmem:[%s3439_s0 + $0x16c] sm:$0xf]  ;;  %v1882_v25 = vld [vmem:[%s3439_s0 + $0x18c] sm:$0xf0]  ;;  %v2324_v27 = vld [vmem:[%s3439_s0 + $0x190] sm:$0xf0] }
  0x2f   :  { %v1888_v26 = vld [vmem:[%s3439_s0 + $0x170] sm:$0xf] }
  0x30   :  { %1194 = vmatpush.bf16.msrb.mxu3 %v2374_v34  ;;  %1243 = vmatpush.bf16.msrb.mxu0 %v2382_v35  ;;  %v1749_v34 = vor.u32 %v2284_v28, %v1746_v29  ;;  %v1753_v35 = vor.u32 %v2289_v31, %v1752_v30  ;;  %v2320_v28 = vld [vmem:[%s3439_s0 + $0x174] sm:$0xf]  ;;  %v1890_v29 = vld [vmem:[%s3439_s0 + $0x194] sm:$0xf0]  ;;  %v2325_v31 = vld [vmem:[%s3439_s0 + $0x198] sm:$0xf0] }
  0x31   :  { %1067 = vmatmul.bf16.gmra.mxu1 %v1809_v46  ;;  %1077 = vmatmul.bf16.gmra.mxu2 %v1881_v47  ;;  %v1788_v46 = vld [vmem:[%s3439_s0 + $0xa0] sm:$0xf]  ;;  %v2298_v47 = vld [vmem:[%s3439_s0 + $0xc0] sm:$0xf0]  ;;  %v1896_v30 = vld [vmem:[%s3439_s0 + $0x178] sm:$0xf] }
  0x32   :  { %1146 = vmatpush.bf16.msrb.mxu2 %v2365_v44  ;;  %1097 = vmatpush.bf16.msrb.mxu1 %v2357_v45  ;;  %v2293_v44 = vld [vmem:[%s3439_s0 + $0x9c] sm:$0xf]  ;;  %v1782_v45 = vld [vmem:[%s3439_s0 + $0xbc] sm:$0xf0] }
  0x33   :  { %1087 = vmatmul.bf16.gmra.mxu3 %v1953_v48  ;;  %1057 = vmatmul.bf16.gmra.mxu0 %v1737_v49  ;;  %v1777_v48 = vor.u32 %v2292_v40, %v1774_v41  ;;  %v1781_v49 = vor.u32 %v2297_v43, %v1780_v42  ;;  %v2328_v40 = vld [vmem:[%s3439_s0 + $0x1b4] sm:$0xf]  ;;  %v1918_v41 = vld [vmem:[%s3439_s0 + $0x1d4] sm:$0xf0]  ;;  %v2333_v43 = vld [vmem:[%s3439_s0 + $0x1d8] sm:$0xf0] }
  0x34   :  { %1195 = vmatpush.bf16.msrb.mxu3 %v2373_v50  ;;  %1244 = vmatpush.bf16.msrb.mxu0 %v2381_v51  ;;  %v1785_v50 = vor.u32 %v2293_v44, %v1782_v45  ;;  %v1789_v51 = vor.u32 %v2298_v47, %v1788_v46  ;;  %v1924_v42 = vld [vmem:[%s3439_s0 + $0x1b8] sm:$0xf]  ;;  %v2329_v44 = vld [vmem:[%s3439_s0 + $0x1bc] sm:$0xf]  ;;  %v1926_v45 = vld [vmem:[%s3439_s0 + $0x1dc] sm:$0xf0] }
  0x35   :  { %v1932_v46 = vld [vmem:[%s3439_s0 + $0x1c0] sm:$0xf]  ;;  %v2334_v47 = vld [vmem:[%s3439_s0 + $0x1e0] sm:$0xf0] }
  0x36   :  { %1147 = vmatpush.bf16.msrb.mxu2 %v2364_v52  ;;  %1098 = vmatpush.bf16.msrb.mxu1 %v2356_v53  ;;  %v2397_v52 = vld [vmem:[%s3438_s1 + $0x198] sm:$0xff] }
  0x37   :  { %v2405_v53 = vld [vmem:[%s3438_s1 + $0x1d8] sm:$0xff] }
  0x38   :  { %1196 = vmatpush.bf16.msrb.mxu3 %v2372_v54  ;;  %1245 = vmatpush.bf16.msrb.mxu0 %v2380_v55  ;;  %v2389_v54 = vld [vmem:[%s3438_s1 + $0x158] sm:$0xff] }
  0x39   :  { %v2413_v55 = vld [vmem:[%s3438_s1 + $0x218] sm:$0xff] }
  0x3a   :  { %1148 = vmatpush.bf16.msrb.mxu2 %v2363_v56  ;;  %1099 = vmatpush.bf16.msrb.mxu1 %v2355_v57  ;;  %v2301_v56 = vld [vmem:[%s3439_s0 + $0xdc] sm:$0xf]  ;;  %v1810_v57 = vld [vmem:[%s3439_s0 + $0xfc] sm:$0xf0] }
  0x3c   :  { %1197 = vmatpush.bf16.msrb.mxu3 %v2371_v58  ;;  %1246 = vmatpush.bf16.msrb.mxu0 %v2379_v59  ;;  %v1816_v58 = vld [vmem:[%s3439_s0 + $0xe0] sm:$0xf]  ;;  %v2306_v59 = vld [vmem:[%s3439_s0 + $0x100] sm:$0xf0] }
  0x3d   :  { %v1817_v1 = vor.u32 %v2306_v59, %v1816_v58  ;;  %v2337_v58 = vld [vmem:[%s3439_s0 + $0x1fc] sm:$0xf]  ;;  %v1954_v59 = vld [vmem:[%s3439_s0 + $0x21c] sm:$0xf0] }
  0x3e   :  { %1149 = vmatpush.bf16.msrb.mxu2 %v2362_v60  ;;  %1100 = vmatpush.bf16.msrb.mxu1 %v2354_v61  ;;  %v2302_v60 = vld [vmem:[%s3439_s0 + $0xe4] sm:$0xf]  ;;  %v1818_v61 = vld [vmem:[%s3439_s0 + $0x104] sm:$0xf0] }
  0x40   :  { %1198 = vmatpush.bf16.msrb.mxu3 %v2370_v63  ;;  %1247 = vmatpush.bf16.msrb.mxu0 %v2378_v0  ;;  %v2307_v63 = vld [vmem:[%s3439_s0 + $0x108] sm:$0xf0]  ;;  %v1813_v0 = vor.u32 %v2301_v56, %v1810_v57 }
  0x41   :  { %1101 = vmatmul.bf16.vlgmr.msrb.gmra.mxu1 %v1705_v12  ;;  %1150 = vmatmul.bf16.vlgmr.msrb.gmra.mxu2 %v1709_v13  ;;  %v2311_v12 = vld [vmem:[%s3439_s0 + $0x12c] sm:$0xf]  ;;  %v1854_v13 = vld [vmem:[%s3439_s0 + $0x14c] sm:$0xf0] }
  0x42   :  { %1338 = vmatpush.bf16.msra.mxu2 %v2401_v2  ;;  %1289 = vmatpush.bf16.msra.mxu1 %v2393_v3  ;;  %v1821_v2 = vor.u32 %v2302_v60, %v1818_v61  ;;  %v1825_v3 = vor.u32 %v2307_v63, %v1824_v62  ;;  %v1960_v60 = vld [vmem:[%s3439_s0 + $0x200] sm:$0xf]  ;;  %v2342_v61 = vld [vmem:[%s3439_s0 + $0x220] sm:$0xf0]  ;;  %v1962_v63 = vld [vmem:[%s3439_s0 + $0x224] sm:$0xf0] }
  0x43   :  { %1199 = vmatmul.bf16.vlgmr.msrb.gmra.mxu3 %v1713_v14  ;;  %1248 = vmatmul.bf16.vlgmr.msrb.gmra.mxu0 %v1717_v15  ;;  %v1860_v14 = vld [vmem:[%s3439_s0 + $0x130] sm:$0xf]  ;;  %v2316_v15 = vld [vmem:[%s3439_s0 + $0x150] sm:$0xf0]  ;;  %v2338_v62 = vld [vmem:[%s3439_s0 + $0x204] sm:$0xf] }
  0x44   :  { %1387 = vmatpush.bf16.msra.mxu3 %v2409_v10  ;;  %1436 = vmatpush.bf16.msra.mxu0 %v2417_v11  ;;  %v1852_v10 = vld [vmem:[%s3439_s0 + $0x128] sm:$0xf]  ;;  %v2315_v11 = vld [vmem:[%s3439_s0 + $0x148] sm:$0xf0] }
  0x46   :  { %1339 = vmatpush.bf16.msra.mxu2 %v2400_v16  ;;  %1290 = vmatpush.bf16.msra.mxu1 %v2392_v17  ;;  %v1849_v16 = vor.u32 %v2310_v8, %v1846_v9  ;;  %v1853_v17 = vor.u32 %v2315_v11, %v1852_v10 }
  0x48   :  { %1388 = vmatpush.bf16.msra.mxu3 %v2408_v18  ;;  %1437 = vmatpush.bf16.msra.mxu0 %v2416_v19  ;;  %v1857_v18 = vor.u32 %v2311_v12, %v1854_v13  ;;  %v1861_v19 = vor.u32 %v2316_v15, %v1860_v14  ;;  %v2276_v14 = vld [vmem:[%s3439_s0 + $0x14] sm:$0xf]  ;;  %v1718_v15 = vld [vmem:[%s3439_s0 + $0x34] sm:$0xf0] }
  0x4a   :  { %1340 = vmatpush.bf16.msra.mxu2 %v2399_v20  ;;  %1291 = vmatpush.bf16.msra.mxu1 %v2391_v21  ;;  %v2395_v20 = vld [vmem:[%s3438_s1 + $0x188] sm:$0xff] }
  0x4b   :  { %v2403_v21 = vld [vmem:[%s3438_s1 + $0x1c8] sm:$0xff] }
  0x4c   :  { %1389 = vmatpush.bf16.msra.mxu3 %v2407_v22  ;;  %1438 = vmatpush.bf16.msra.mxu0 %v2415_v23  ;;  %v2387_v22 = vld [vmem:[%s3438_s1 + $0x148] sm:$0xff] }
  0x4d   :  { %v2411_v23 = vld [vmem:[%s3438_s1 + $0x208] sm:$0xff] }
  0x4e   :  { %1341 = vmatpush.bf16.msra.mxu2 %v2398_v36  ;;  %1292 = vmatpush.bf16.msra.mxu1 %v2390_v38  ;;  %v2394_v36 = vld [vmem:[%s3438_s1 + $0x180] sm:$0xff] }
  0x4f   :  { %v2386_v38 = vld [vmem:[%s3438_s1 + $0x140] sm:$0xff] }
  0x50   :  { %1390 = vmatpush.bf16.msra.mxu3 %v2406_v37  ;;  %1439 = vmatpush.bf16.msra.mxu0 %v2414_v39  ;;  %v2402_v37 = vld [vmem:[%s3438_s1 + $0x1c0] sm:$0xff] }
  0x51   :  { %1106 = vmatmul.bf16.gmra.mxu1 %v1741_v32  ;;  %1155 = vmatmul.bf16.gmra.mxu2 %v1745_v33  ;;  %v1885_v32 = vor.u32 %v2319_v24, %v1882_v25  ;;  %v1889_v33 = vor.u32 %v2324_v27, %v1888_v26  ;;  %v2410_v39 = vld [vmem:[%s3438_s1 + $0x200] sm:$0xff]  ;;  %v1721_v24 = vor.u32 %v2276_v14, %v1718_v15 }
  0x52   :  { %1342 = vmatpush.bf16.msra.mxu2 %v2397_v52  ;;  %1293 = vmatpush.bf16.msra.mxu1 %v2389_v54  ;;  %v1933_v52 = vor.u32 %v2334_v47, %v1932_v46  ;;  %v2291_v46 = vld [vmem:[%s3439_s0 + $0x88] sm:$0xf0]  ;;  %v2294_v14 = vld [vmem:[%s3439_s0 + $0xa4] sm:$0xf] }
  0x53   :  { %1204 = vmatmul.bf16.gmra.mxu3 %v1749_v34  ;;  %1253 = vmatmul.bf16.gmra.mxu0 %v1753_v35  ;;  %v1893_v34 = vor.u32 %v2320_v28, %v1890_v29  ;;  %v1897_v35 = vor.u32 %v2325_v31, %v1896_v30 }
  0x54   :  { %1391 = vmatpush.bf16.msra.mxu3 %v2405_v53  ;;  %1440 = vmatpush.bf16.msra.mxu0 %v2413_v55 }
  0x56   :  { %1343 = vmatpush.bf16.msra.mxu2 %v2396_v4  ;;  %1294 = vmatpush.bf16.msra.mxu1 %v2388_v6  ;;  %v1957_v4 = vor.u32 %v2337_v58, %v1954_v59 }
  0x58   :  { %1392 = vmatpush.bf16.msra.mxu3 %v2404_v5  ;;  %1441 = vmatpush.bf16.msra.mxu0 %v2412_v7  ;;  %v1961_v5 = vor.u32 %v2342_v61, %v1960_v60  ;;  %v1965_v7 = vor.u32 %v2338_v62, %v1962_v63 }
  0x5a   :  { %1344 = vmatpush.bf16.msra.mxu2 %v2395_v20  ;;  %1295 = vmatpush.bf16.msra.mxu1 %v2387_v22  ;;  %v1732_v20 = vld [vmem:[%s3439_s0 + $0x20] sm:$0xf] }
  0x5c   :  { %1393 = vmatpush.bf16.msra.mxu3 %v2403_v21  ;;  %1442 = vmatpush.bf16.msra.mxu0 %v2411_v23  ;;  %v2282_v21 = vld [vmem:[%s3439_s0 + $0x40] sm:$0xf0] }
  0x5d   :  { %v1733_v28 = vor.u32 %v2282_v21, %v1732_v20  ;;  %v2300_v20 = vld [vmem:[%s3439_s0 + $0xd0] sm:$0xf0] }
  0x5e   :  { %1345 = vmatpush.bf16.msra.mxu2 %v2394_v36  ;;  %1296 = vmatpush.bf16.msra.mxu1 %v2386_v38  ;;  %v2285_v38 = vld [vmem:[%s3439_s0 + $0x5c] sm:$0xf] }
  0x60   :  { %1394 = vmatpush.bf16.msra.mxu3 %v2402_v37  ;;  %1443 = vmatpush.bf16.msra.mxu0 %v2410_v39  ;;  %v1754_v39 = vld [vmem:[%s3439_s0 + $0x7c] sm:$0xf0] }
  0x61   :  { %1111 = vmatmul.bf16.gmra.mxu1 %v1777_v48  ;;  %1160 = vmatmul.bf16.gmra.mxu2 %v1781_v49  ;;  %v1921_v48 = vor.u32 %v2328_v40, %v1918_v41  ;;  %v1925_v49 = vor.u32 %v2333_v43, %v1924_v42  ;;  %v1760_v41 = vld [vmem:[%s3439_s0 + $0x60] sm:$0xf]  ;;  %v2290_v42 = vld [vmem:[%s3439_s0 + $0x80] sm:$0xf0] }
  0x62   :  { %v2286_v43 = vld [vmem:[%s3439_s0 + $0x64] sm:$0xf] }
  0x63   :  { %1209 = vmatmul.bf16.gmra.mxu3 %v1785_v50  ;;  %1258 = vmatmul.bf16.gmra.mxu0 %v1789_v51  ;;  %v1929_v51 = vor.u32 %v2329_v44, %v1926_v45  ;;  %v1762_v44 = vld [vmem:[%s3439_s0 + $0x84] sm:$0xf0] }
  0x64   :  { %v1768_v45 = vld [vmem:[%s3439_s0 + $0x68] sm:$0xf] }
  0x65   :  { %v1769_v58 = vor.u32 %v2291_v46, %v1768_v45  ;;  %v1832_v45 = vld [vmem:[%s3439_s0 + $0xf0] sm:$0xf]  ;;  %v2308_v46 = vld [vmem:[%s3439_s0 + $0x110] sm:$0xf0] }
  0x71   :  { %1116 = vmatmul.bf16.gmra.mxu1 %v1813_v0  ;;  %1165 = vmatmul.bf16.gmra.mxu2 %v1817_v1  ;;  %v1968_v0 = vld [vmem:[%s3439_s0 + $0x208] sm:$0xf]  ;;  %v2343_v1 = vld [vmem:[%s3439_s0 + $0x228] sm:$0xf0] }
  0x72   :  { %v1969_v8 = vor.u32 %v2343_v1, %v1968_v0 }
  0x73   :  { %1214 = vmatmul.bf16.gmra.mxu3 %v1821_v2  ;;  %1263 = vmatmul.bf16.gmra.mxu0 %v1825_v3 }
  0x81   :  { %1121 = vmatmul.bf16.gmra.mxu1 %v1849_v16  ;;  %1170 = vmatmul.bf16.gmra.mxu2 %v1853_v17  ;;  %v1724_v16 = vld [vmem:[%s3439_s0 + $0x18] sm:$0xf]  ;;  %v2281_v17 = vld [vmem:[%s3439_s0 + $0x38] sm:$0xf0] }
  0x82   :  { %v1725_v25 = vor.u32 %v2281_v17, %v1724_v16  ;;  %v1796_v16 = vld [vmem:[%s3439_s0 + $0xa8] sm:$0xf]  ;;  %v2299_v17 = vld [vmem:[%s3439_s0 + $0xc8] sm:$0xf0] }
  0x83   :  { %1219 = vmatmul.bf16.gmra.mxu3 %v1857_v18  ;;  %1268 = vmatmul.bf16.gmra.mxu0 %v1861_v19  ;;  %v2277_v18 = vld [vmem:[%s3439_s0 + $0x1c] sm:$0xf]  ;;  %v1726_v19 = vld [vmem:[%s3439_s0 + $0x3c] sm:$0xf0] }
  0x84   :  { %v1729_v27 = vor.u32 %v2277_v18, %v1726_v19  ;;  %v1798_v18 = vld [vmem:[%s3439_s0 + $0xcc] sm:$0xf0] }
  0x85   :  { %v1804_v19 = vld [vmem:[%s3439_s0 + $0xb0] sm:$0xf] }
  0x91   :  { %1126 = vmatmul.bf16.gmra.mxu1 %v1885_v32  ;;  %1175 = vmatmul.bf16.gmra.mxu2 %v1889_v33 }
  0x93   :  { %1224 = vmatmul.bf16.gmra.mxu3 %v1893_v34  ;;  %1273 = vmatmul.bf16.gmra.mxu0 %v1897_v35 }
  0x9e   :  { %v2946_v50 = vpop.f32.mrf.mxu1 }
  0xa0   :  { %v1053_v53 = vpop.f32.mrf.mxu0 }
  0xa1   :  { %1131 = vmatmul.bf16.gmra.mxu1 %v1921_v48  ;;  %1180 = vmatmul.bf16.gmra.mxu2 %v1925_v49 }
  0xa3   :  { %1229 = vmatmul.bf16.gmra.mxu3 %v1929_v51  ;;  %1278 = vmatmul.bf16.gmra.mxu0 %v1933_v52  ;;  %v1757_v51 = vor.u32 %v2285_v38, %v1754_v39  ;;  %v1761_v52 = vor.u32 %v2290_v42, %v1760_v41 }
  0xa4   :  { %v2948_v54 = vpop.f32.mrf.mxu2 }
  0xa6   :  { %v2950_v55 = vpop.f32.mrf.mxu3  ;;  %v2952_v56 = vpop.f32.mrf.mxu1 }
  0xa8   :  { %v1055_v57 = vpop.f32.mrf.mxu0 }
  0xac   :  { %v2978_v2 = vpop.f32.mrf.mxu2 }
  0xae   :  { %v2980_v3 = vpop.f32.mrf.mxu3  ;;  %v2982_v6 = vpop.f32.mrf.mxu1 }
  0xb0   :  { %v1058_v9 = vpop.f32.mrf.mxu0 }
  0xb1   :  { %1136 = vmatmul.bf16.gmra.mxu1 %v1957_v4  ;;  %1185 = vmatmul.bf16.gmra.mxu2 %v1961_v5 }
  0xb3   :  { %1234 = vmatmul.bf16.gmra.mxu3 %v1965_v7  ;;  %1283 = vmatmul.bf16.gmra.mxu0 %v1969_v8 }
  0xb4   :  { %v2984_v10 = vpop.f32.mrf.mxu2 }
  0xb6   :  { %v2986_v11 = vpop.f32.mrf.mxu3  ;;  %v2988_v12 = vpop.f32.mrf.mxu1 }
  0xb8   :  { %v1060_v13 = vpop.f32.mrf.mxu0 }
  0xbc   :  { %v3014_v22 = vpop.f32.mrf.mxu2 }
  0xbe   :  { %v3016_v23 = vpop.f32.mrf.mxu3  ;;  %v1102_v26 = vpop.f32.mrf.mxu1 }
  0xbf   :  { %v1103_v29 = vadd.f32 %v1102_v26, %v1053_v53 }
  0xc0   :  { %v1249_v30 = vpop.f32.mrf.mxu0 }
  0xc1   :  { %1297 = vmatmul.bf16.vlgmr.msra.gmra.mxu1 %v1721_v24  ;;  %1346 = vmatmul.bf16.vlgmr.msra.gmra.mxu2 %v1725_v25 }
  0xc3   :  { %1395 = vmatmul.bf16.vlgmr.msra.gmra.mxu3 %v1729_v27  ;;  %1444 = vmatmul.bf16.vlgmr.msra.gmra.mxu0 %v1733_v28  ;;  %v1797_v27 = vor.u32 %v2299_v17, %v1796_v16 }
  0xc4   :  { %v1151_v31 = vpop.f32.mrf.mxu2 }
  0xc5   :  { %v1152_v32 = vadd.f32 %v1151_v31, %v1103_v29 }
  0xc6   :  { %v1200_v33 = vpop.f32.mrf.mxu3  ;;  %v1104_v34 = vpop.f32.mrf.mxu1 }
  0xc7   :  { %v1201_v35 = vadd.f32 %v1200_v33, %v1152_v32  ;;  %v1105_v36 = vadd.f32 %v1104_v34, %v1055_v57  ;;  %v1765_v57 = vor.u32 %v2286_v43, %v1762_v44  ;;  %v2303_v43 = vld [vmem:[%s3439_s0 + $0xec] sm:$0xf] }
  0xc8   :  { %v1251_v37 = vpop.f32.mrf.mxu0 }
  0xc9   :  { %v3024_v40 = vadd.f32 %v1249_v30, %v1201_v35  ;;  %v1805_v30 = vor.u32 %v2300_v20, %v1804_v19  ;;  %v1868_v19 = vld [vmem:[%s3439_s0 + $0x138] sm:$0xf]  ;;  %v2317_v20 = vld [vmem:[%s3439_s0 + $0x158] sm:$0xf0] }
  0xcc   :  { %v1153_v47 = vpop.f32.mrf.mxu2 }
  0xcd   :  { %v1154_v48 = vadd.f32 %v1153_v47, %v1105_v36  ;;  %v1834_v47 = vld [vmem:[%s3439_s0 + $0x114] sm:$0xf0] }
  0xce   :  { %v1202_v49 = vpop.f32.mrf.mxu3  ;;  %v1107_v53 = vpop.f32.mrf.mxu1 }
  0xcf   :  { %v1203_v59 = vadd.f32 %v1202_v49, %v1154_v48  ;;  %v1108_v60 = vadd.f32 %v1107_v53, %v1058_v9  ;;  %v1790_v9 = vld [vmem:[%s3439_s0 + $0xc4] sm:$0xf0]  ;;  %v1840_v48 = vld [vmem:[%s3439_s0 + $0xf8] sm:$0xf]  ;;  %v2309_v49 = vld [vmem:[%s3439_s0 + $0x118] sm:$0xf0] }
  0xd0   :  { %v1254_v61 = vpop.f32.mrf.mxu0  ;;  %v1793_v26 = vor.u32 %v2294_v14, %v1790_v9 }
  0xd1   :  { %1302 = vmatmul.bf16.gmra.mxu1 %v1757_v51  ;;  %1351 = vmatmul.bf16.gmra.mxu2 %v1761_v52  ;;  %v3044_v62 = vadd.f32 %v1251_v37, %v1203_v59 }
  0xd3   :  { %1400 = vmatmul.bf16.gmra.mxu3 %v1765_v57  ;;  %1449 = vmatmul.bf16.gmra.mxu0 %v1769_v58  ;;  %v1833_v58 = vor.u32 %v2308_v46, %v1832_v45  ;;  %v2321_v46 = vld [vmem:[%s3439_s0 + $0x17c] sm:$0xf] }
  0xd4   :  { %v1156_v63 = vpop.f32.mrf.mxu2 }
  0xd5   :  { %v1157_v0 = vadd.f32 %v1156_v63, %v1108_v60 }
  0xd6   :  { %v1205_v1 = vpop.f32.mrf.mxu3  ;;  %v1109_v4 = vpop.f32.mrf.mxu1 }
  0xd7   :  { %v1206_v5 = vadd.f32 %v1205_v1, %v1157_v0  ;;  %v1110_v7 = vadd.f32 %v1109_v4, %v1060_v13  ;;  %v2295_v13 = vld [vmem:[%s3439_s0 + $0xac] sm:$0xf] }
  0xd8   :  { %v1256_v8 = vpop.f32.mrf.mxu0  ;;  %v1801_v29 = vor.u32 %v2295_v13, %v1798_v18  ;;  %v2312_v13 = vld [vmem:[%s3439_s0 + $0x134] sm:$0xf] }
  0xd9   :  { %v3052_v15 = vadd.f32 %v1254_v61, %v1206_v5  ;;  %v1841_v61 = vor.u32 %v2309_v49, %v1840_v48  ;;  %v2326_v48 = vld [vmem:[%s3439_s0 + $0x1a0] sm:$0xf0] }
  0xda   :  { %v2322_v49 = vld [vmem:[%s3439_s0 + $0x184] sm:$0xf] }
  0xdc   :  { %v1158_v21 = vpop.f32.mrf.mxu2 }
  0xdd   :  { %v1159_v24 = vadd.f32 %v1158_v21, %v1110_v7  ;;  %v1870_v21 = vld [vmem:[%s3439_s0 + $0x15c] sm:$0xf0] }
  0xde   :  { %v1207_v25 = vpop.f32.mrf.mxu3  ;;  %v1112_v28 = vpop.f32.mrf.mxu1 }
  0xdf   :  { %v1208_v31 = vadd.f32 %v1207_v25, %v1159_v24  ;;  %v1113_v32 = vadd.f32 %v1112_v28, %v2946_v50  ;;  %v1826_v50 = vld [vmem:[%s3439_s0 + $0x10c] sm:$0xf0]  ;;  %v1876_v24 = vld [vmem:[%s3439_s0 + $0x140] sm:$0xf]  ;;  %v2318_v25 = vld [vmem:[%s3439_s0 + $0x160] sm:$0xf0] }
  0xe0   :  { %v1259_v33 = vpop.f32.mrf.mxu0  ;;  %v1829_v57 = vor.u32 %v2303_v43, %v1826_v50 }
  0xe1   :  { %1307 = vmatmul.bf16.gmra.mxu1 %v1793_v26  ;;  %1356 = vmatmul.bf16.gmra.mxu2 %v1797_v27  ;;  %v3073_v34 = vadd.f32 %v1256_v8, %v1208_v31 }
  0xe3   :  { %1405 = vmatmul.bf16.gmra.mxu3 %v1801_v29  ;;  %1454 = vmatmul.bf16.gmra.mxu0 %v1805_v30  ;;  %v1869_v30 = vor.u32 %v2317_v20, %v1868_v19  ;;  %v2330_v20 = vld [vmem:[%s3439_s0 + $0x1c4] sm:$0xf] }
  0xe4   :  { %v1161_v35 = vpop.f32.mrf.mxu2 }
  0xe5   :  { %v1162_v36 = vadd.f32 %v1161_v35, %v1113_v32 }
  0xe6   :  { %v1210_v37 = vpop.f32.mrf.mxu3  ;;  %v1114_v38 = vpop.f32.mrf.mxu1 }
  0xe7   :  { %v1211_v39 = vadd.f32 %v1210_v37, %v1162_v36  ;;  %v1115_v41 = vadd.f32 %v1114_v38, %v2952_v56  ;;  %v2304_v56 = vld [vmem:[%s3439_s0 + $0xf4] sm:$0xf] }
  0xe8   :  { %v1261_v42 = vpop.f32.mrf.mxu0  ;;  %v1837_v60 = vor.u32 %v2304_v56, %v1834_v47  ;;  %v1898_v56 = vld [vmem:[%s3439_s0 + $0x19c] sm:$0xf0] }
  0xe9   :  { %v3082_v44 = vadd.f32 %v1259_v33, %v1211_v39  ;;  %v1877_v33 = vor.u32 %v2318_v25, %v1876_v24  ;;  %v2335_v24 = vld [vmem:[%s3439_s0 + $0x1e8] sm:$0xf0] }
  0xea   :  { %v2331_v25 = vld [vmem:[%s3439_s0 + $0x1cc] sm:$0xf] }
  0xec   :  { %v1163_v51 = vpop.f32.mrf.mxu2 }
  0xed   :  { %v1164_v52 = vadd.f32 %v1163_v51, %v1115_v41 }
  0xee   :  { %v1212_v53 = vpop.f32.mrf.mxu3  ;;  %v1117_v59 = vpop.f32.mrf.mxu1 }
  0xef   :  { %v1213_v63 = vadd.f32 %v1212_v53, %v1164_v52  ;;  %v1118_v0 = vadd.f32 %v1117_v59, %v2982_v6  ;;  %v1862_v6 = vld [vmem:[%s3439_s0 + $0x154] sm:$0xf0]  ;;  %v1906_v52 = vld [vmem:[%s3439_s0 + $0x1a4] sm:$0xf0] }
  0xf0   :  { %v1264_v1 = vpop.f32.mrf.mxu0  ;;  %v1865_v29 = vor.u32 %v2312_v13, %v1862_v6  ;;  %v1912_v53 = vld [vmem:[%s3439_s0 + $0x188] sm:$0xf] }
  0xf1   :  { %1312 = vmatmul.bf16.gmra.mxu1 %v1829_v57  ;;  %1361 = vmatmul.bf16.gmra.mxu2 %v1833_v58  ;;  %v3103_v4 = vadd.f32 %v1261_v42, %v1213_v63  ;;  %v2327_v57 = vld [vmem:[%s3439_s0 + $0x1a8] sm:$0xf0] }
  0xf3   :  { %1410 = vmatmul.bf16.gmra.mxu3 %v1837_v60  ;;  %1459 = vmatmul.bf16.gmra.mxu0 %v1841_v61  ;;  %v1901_v61 = vor.u32 %v2321_v46, %v1898_v56 }
  0xf4   :  { %v1166_v5 = vpop.f32.mrf.mxu2 }
  0xf5   :  { %v1167_v7 = vadd.f32 %v1166_v5, %v1118_v0 }
  0xf6   :  { %v1215_v8 = vpop.f32.mrf.mxu3  ;;  %v1119_v14 = vpop.f32.mrf.mxu1 }
  0xf7   :  { %v1216_v9 = vadd.f32 %v1215_v8, %v1167_v7  ;;  %v1120_v16 = vadd.f32 %v1119_v14, %v2988_v12  ;;  %v2313_v12 = vld [vmem:[%s3439_s0 + $0x13c] sm:$0xf] }
  0xf8   :  { %v1266_v17 = vpop.f32.mrf.mxu0  ;;  %v1873_v32 = vor.u32 %v2313_v12, %v1870_v21  ;;  %v1934_v12 = vld [vmem:[%s3439_s0 + $0x1e4] sm:$0xf0] }
  0xf9   :  { %v3112_v18 = vadd.f32 %v1264_v1, %v1216_v9  ;;  %v1909_v1 = vor.u32 %v2322_v49, %v1906_v52  ;;  %v2339_v49 = vld [vmem:[%s3439_s0 + $0x20c] sm:$0xf] }
  0xfc   :  { %v1168_v26 = vpop.f32.mrf.mxu2 }
  0xfd   :  { %v1169_v27 = vadd.f32 %v1168_v26, %v1120_v16 }
  0xfe   :  { %v1217_v28 = vpop.f32.mrf.mxu3  ;;  %v1122_v31 = vpop.f32.mrf.mxu1 }
  0xff   :  { %v1218_v35 = vadd.f32 %v1217_v28, %v1169_v27  ;;  %v1123_v38 = vadd.f32 %v1122_v31, %v2948_v54  ;;  %v1904_v54 = vld [vmem:[%s3439_s0 + $0x180] sm:$0xf]  ;;  %v1942_v27 = vld [vmem:[%s3439_s0 + $0x1ec] sm:$0xf0] }
 0x100   :  { %v1269_v36 = vpop.f32.mrf.mxu0  ;;  %v1905_v63 = vor.u32 %v2326_v48, %v1904_v54  ;;  %v1948_v28 = vld [vmem:[%s3439_s0 + $0x1d0] sm:$0xf] }
 0x101   :  { %1317 = vmatmul.bf16.gmra.mxu1 %v1865_v29  ;;  %1366 = vmatmul.bf16.gmra.mxu2 %v1869_v30  ;;  %v3132_v37 = vadd.f32 %v1266_v17, %v1218_v35  ;;  %v2336_v29 = vld [vmem:[%s3439_s0 + $0x1f0] sm:$0xf0] }
 0x103   :  { %1415 = vmatmul.bf16.gmra.mxu3 %v1873_v32  ;;  %1464 = vmatmul.bf16.gmra.mxu0 %v1877_v33  ;;  %v1937_v33 = vor.u32 %v2330_v20, %v1934_v12 }
 0x104   :  { %v1171_v39 = vpop.f32.mrf.mxu2 }
 0x105   :  { %v1172_v41 = vadd.f32 %v1171_v39, %v1123_v38  ;;  %v1945_v38 = vor.u32 %v2331_v25, %v1942_v27 }
 0x106   :  { %v1220_v42 = vpop.f32.mrf.mxu3  ;;  %v1124_v43 = vpop.f32.mrf.mxu1 }
 0x107   :  { %v1221_v50 = vadd.f32 %v1220_v42, %v1172_v41  ;;  %v1125_v51 = vadd.f32 %v1124_v43, %v2978_v2  ;;  %v1913_v2 = vor.u32 %v2327_v57, %v1912_v53  ;;  %v2344_v53 = vld [vmem:[%s3439_s0 + $0x230] sm:$0xf0] }
 0x108   :  { %v1271_v45 = vpop.f32.mrf.mxu0  ;;  %v2340_v57 = vld [vmem:[%s3439_s0 + $0x214] sm:$0xf] }
 0x109   :  { %v3141_v47 = vadd.f32 %v1269_v36, %v1221_v50 }
 0x10c   :  { %v1173_v58 = vpop.f32.mrf.mxu2 }
 0x10d   :  { %v1174_v59 = vadd.f32 %v1173_v58, %v1125_v51  ;;  %v1970_v51 = vld [vmem:[%s3439_s0 + $0x22c] sm:$0xf0] }
 0x10e   :  { %v1222_v60 = vpop.f32.mrf.mxu3  ;;  %v1127_v0 = vpop.f32.mrf.mxu1 }
 0x10f   :  { %v1223_v5 = vadd.f32 %v1222_v60, %v1174_v59  ;;  %v1128_v14 = vadd.f32 %v1127_v0, %v2984_v10  ;;  %v1940_v10 = vld [vmem:[%s3439_s0 + $0x1c8] sm:$0xf]  ;;  %v1978_v59 = vld [vmem:[%s3439_s0 + $0x234] sm:$0xf0] }
 0x110   :  { %v1274_v7 = vpop.f32.mrf.mxu0  ;;  %v1941_v35 = vor.u32 %v2335_v24, %v1940_v10  ;;  %v1984_v60 = vld [vmem:[%s3439_s0 + $0x218] sm:$0xf] }
 0x111   :  { %1322 = vmatmul.bf16.gmra.mxu1 %v1901_v61  ;;  %1371 = vmatmul.bf16.gmra.mxu2 %v1905_v63  ;;  %v3162_v8 = vadd.f32 %v1271_v45, %v1223_v5  ;;  %v2345_v61 = vld [vmem:[%s3439_s0 + $0x238] sm:$0xf0] }
 0x113   :  { %1420 = vmatmul.bf16.gmra.mxu3 %v1909_v1  ;;  %1469 = vmatmul.bf16.gmra.mxu0 %v1913_v2  ;;  %v1973_v2 = vor.u32 %v2339_v49, %v1970_v51 }
 0x114   :  { %v1176_v9 = vpop.f32.mrf.mxu2 }
 0x115   :  { %v1177_v16 = vadd.f32 %v1176_v9, %v1128_v14  ;;  %v1981_v14 = vor.u32 %v2340_v57, %v1978_v59 }
 0x116   :  { %v1225_v17 = vpop.f32.mrf.mxu3  ;;  %v1129_v13 = vpop.f32.mrf.mxu1 }
 0x117   :  { %v1226_v6 = vadd.f32 %v1225_v17, %v1177_v16  ;;  %v1130_v26 = vadd.f32 %v1129_v13, %v3014_v22  ;;  %v1949_v22 = vor.u32 %v2336_v29, %v1948_v28 }
 0x118   :  { %v1276_v19 = vpop.f32.mrf.mxu0 }
 0x119   :  { %v3171_v21 = vadd.f32 %v1274_v7, %v1226_v6 }
 0x11c   :  { %v1178_v30 = vpop.f32.mrf.mxu2 }
 0x11d   :  { %v1179_v31 = vadd.f32 %v1178_v30, %v1130_v26 }
 0x11e   :  { %v1227_v32 = vpop.f32.mrf.mxu3  ;;  %v1132_v36 = vpop.f32.mrf.mxu1 }
 0x11f   :  { %v1228_v39 = vadd.f32 %v1227_v32, %v1179_v31  ;;  %v1133_v43 = vadd.f32 %v1132_v36, %v2950_v55  ;;  %v1976_v55 = vld [vmem:[%s3439_s0 + $0x210] sm:$0xf] }
 0x120   :  { %v1279_v41 = vpop.f32.mrf.mxu0  ;;  %v1977_v5 = vor.u32 %v2344_v53, %v1976_v55 }
 0x121   :  { %1327 = vmatmul.bf16.gmra.mxu1 %v1937_v33  ;;  %1376 = vmatmul.bf16.gmra.mxu2 %v1941_v35  ;;  %v3192_v42 = vadd.f32 %v1276_v19, %v1228_v39 }
 0x123   :  { %1425 = vmatmul.bf16.gmra.mxu3 %v1945_v38  ;;  %1474 = vmatmul.bf16.gmra.mxu0 %v1949_v22 }
 0x124   :  { %v1181_v50 = vpop.f32.mrf.mxu2 }
 0x125   :  { %v1182_v45 = vadd.f32 %v1181_v50, %v1133_v43 }
 0x126   :  { %v1230_v46 = vpop.f32.mrf.mxu3  ;;  %v1134_v56 = vpop.f32.mrf.mxu1 }
 0x127   :  { %v1231_v54 = vadd.f32 %v1230_v46, %v1182_v45  ;;  %v1135_v58 = vadd.f32 %v1134_v56, %v2980_v3  ;;  %v1985_v3 = vor.u32 %v2345_v61, %v1984_v60 }
 0x128   :  { %v1281_v48 = vpop.f32.mrf.mxu0 }
 0x129   :  { %v3201_v52 = vadd.f32 %v1279_v41, %v1231_v54 }
 0x12c   :  { %v1183_v63 = vpop.f32.mrf.mxu2 }
 0x12d   :  { %v1184_v0 = vadd.f32 %v1183_v63, %v1135_v58 }
 0x12e   :  { %v1232_v1 = vpop.f32.mrf.mxu3  ;;  %v1137_v7 = vpop.f32.mrf.mxu1 }
 0x12f   :  { %v1233_v9 = vadd.f32 %v1232_v1, %v1184_v0  ;;  %v1138_v13 = vadd.f32 %v1137_v7, %v2986_v11 }
 0x130   :  { %v1284_v16 = vpop.f32.mrf.mxu0 }
 0x131   :  { %1332 = vmatmul.bf16.gmra.mxu1 %v1973_v2  ;;  %1381 = vmatmul.bf16.gmra.mxu2 %v1977_v5  ;;  %v3222_v17 = vadd.f32 %v1281_v48, %v1233_v9 }
 0x133   :  { %1430 = vmatmul.bf16.gmra.mxu3 %v1981_v14  ;;  %1479 = vmatmul.bf16.gmra.mxu0 %v1985_v3 }
 0x134   :  { %v1186_v6 = vpop.f32.mrf.mxu2 }
 0x135   :  { %v1187_v19 = vadd.f32 %v1186_v6, %v1138_v13 }
 0x136   :  { %v1235_v20 = vpop.f32.mrf.mxu3  ;;  %v1139_v12 = vpop.f32.mrf.mxu1 }
 0x137   :  { %v1236_v10 = vadd.f32 %v1235_v20, %v1187_v19  ;;  %v1140_v26 = vadd.f32 %v1139_v12, %v3016_v23 }
 0x138   :  { %v1286_v24 = vpop.f32.mrf.mxu0 }
 0x139   :  { %v3225_v25 = vadd.f32 %v1284_v16, %v1236_v10 }
 0x13c   :  { %v1188_v27 = vpop.f32.mrf.mxu2 }
 0x13d   :  { %v1189_v28 = vadd.f32 %v1188_v27, %v1140_v26 }
 0x13e   :  { %v1237_v29 = vpop.f32.mrf.mxu3  ;;  %v1298_v30 = vpop.f32.mrf.mxu1 }
 0x13f   :  { %v1238_v31 = vadd.f32 %v1237_v29, %v1189_v28  ;;  %v1299_v32 = vadd.f32 %v1298_v30, %v3024_v40 }
 0x140   :  { %v1445_v33 = vpop.f32.mrf.mxu0 }
 0x141   :  { %v3229_v35 = vadd.f32 %v1286_v24, %v1238_v31 }
 0x144   :  { %v1347_v11 = vpop.f32.mrf.mxu2 }
 0x145   :  { %v1348_v36 = vadd.f32 %v1347_v11, %v1299_v32 }
 0x146   :  { %v1396_v38 = vpop.f32.mrf.mxu3  ;;  %v1300_v22 = vpop.f32.mrf.mxu1 }
 0x147   :  { %v1397_v39 = vadd.f32 %v1396_v38, %v1348_v36  ;;  %v1301_v41 = vadd.f32 %v1300_v22, %v3044_v62 }
 0x148   :  { %v1447_v43 = vpop.f32.mrf.mxu0 }
 0x149   :  { %v3232_v50 = vadd.f32 %v1445_v33, %v1397_v39 }
 0x14c   :  { %v1349_v23 = vpop.f32.mrf.mxu2 }
 0x14d   :  { %v1350_v45 = vadd.f32 %v1349_v23, %v1301_v41 }
 0x14e   :  { %v1398_v46 = vpop.f32.mrf.mxu3  ;;  %v1303_v56 = vpop.f32.mrf.mxu1 }
 0x14f   :  { %v1399_v54 = vadd.f32 %v1398_v46, %v1350_v45  ;;  %v1304_v40 = vadd.f32 %v1303_v56, %v3052_v15 }
 0x150   :  { %v1450_v48 = vpop.f32.mrf.mxu0 }
 0x151   :  { %v3235_v49 = vadd.f32 %v1447_v43, %v1399_v54 }
 0x153   :  { %v1508_v23 = vmul.f32 %v3235_v49, %v3235_v49 }
 0x154   :  { %v1352_v51 = vpop.f32.mrf.mxu2 }
 0x155   :  { %v1353_v55 = vadd.f32 %v1352_v51, %v1304_v40 }
 0x156   :  { %v1401_v53 = vpop.f32.mrf.mxu3  ;;  %v1305_v57 = vpop.f32.mrf.mxu1 }
 0x157   :  { %v1402_v58 = vadd.f32 %v1401_v53, %v1353_v55  ;;  %v1306_v62 = vadd.f32 %v1305_v57, %v3073_v34 }
 0x158   :  { %v1452_v59 = vpop.f32.mrf.mxu0 }
 0x159   :  { %v3238_v60 = vadd.f32 %v1450_v48, %v1402_v58 }
 0x15b   :  { %v1509_v48 = vmul.f32 %v3238_v60, %v3238_v60 }
 0x15c   :  { %v1354_v61 = vpop.f32.mrf.mxu2 }
 0x15d   :  { %v1355_v63 = vadd.f32 %v1354_v61, %v1306_v62 }
 0x15e   :  { %v1403_v0 = vpop.f32.mrf.mxu3  ;;  %v1308_v1 = vpop.f32.mrf.mxu1 }
 0x15f   :  { %v1404_v2 = vadd.f32 %v1403_v0, %v1355_v63  ;;  %v1309_v15 = vadd.f32 %v1308_v1, %v3082_v44 }
 0x160   :  { %v1455_v5 = vpop.f32.mrf.mxu0 }
 0x161   :  { %v3241_v7 = vadd.f32 %v1452_v59, %v1404_v2 }
 0x164   :  { %v1357_v14 = vpop.f32.mrf.mxu2 }
 0x165   :  { %v1358_v3 = vadd.f32 %v1357_v14, %v1309_v15 }
 0x166   :  { %v1406_v9 = vpop.f32.mrf.mxu3  ;;  %v1310_v16 = vpop.f32.mrf.mxu1 }
 0x167   :  { %v1407_v13 = vadd.f32 %v1406_v9, %v1358_v3  ;;  %v1311_v11 = vadd.f32 %v1310_v16, %v3103_v4  ;;  %v1507_v4 = vmul.f32 %v3232_v50, %v3232_v50 }
 0x168   :  { %v1457_v6 = vpop.f32.mrf.mxu0 }
 0x169   :  { %v3243_v34 = vadd.f32 %v1455_v5, %v1407_v13  ;;  %v1523_v58 = vadd.f32 %v1508_v23, %v1507_v4 }
 0x16b   :  { %v1524_v0 = vadd.f32 %v1523_v58, %v1509_v48  ;;  %v1511_v1 = vmul.f32 %v3243_v34, %v3243_v34 }
 0x16c   :  { %v1359_v19 = vpop.f32.mrf.mxu2 }
 0x16d   :  { %v1360_v22 = vadd.f32 %v1359_v19, %v1311_v11 }
 0x16e   :  { %v1408_v20 = vpop.f32.mrf.mxu3  ;;  %v1313_v12 = vpop.f32.mrf.mxu1 }
 0x16f   :  { %v1314_v39 = vadd.f32 %v1313_v12, %v3112_v18  ;;  %v1409_v45 = vadd.f32 %v1408_v20, %v1360_v22 }
 0x170   :  { %v1460_v10 = vpop.f32.mrf.mxu0 }
 0x171   :  { %v3260_v62 = vadd.f32 %v1457_v6, %v1409_v45 }
 0x173   :  { %v1512_v3 = vmul.f32 %v3260_v62, %v3260_v62 }
 0x174   :  { %v1362_v24 = vpop.f32.mrf.mxu2 }
 0x175   :  { %v1363_v41 = vadd.f32 %v1362_v24, %v1314_v39 }
 0x176   :  { %v1411_v26 = vpop.f32.mrf.mxu3  ;;  %v1315_v27 = vpop.f32.mrf.mxu1 }
 0x177   :  { %v1316_v43 = vadd.f32 %v1315_v27, %v3132_v37  ;;  %v1412_v51 = vadd.f32 %v1411_v26, %v1363_v41  ;;  %v1485_v37 = vadd.f32 %v3235_v49, %v3232_v50 }
 0x178   :  { %v1462_v28 = vpop.f32.mrf.mxu0 }
 0x179   :  { %v1486_v59 = vadd.f32 %v1485_v37, %v3238_v60  ;;  %v3265_v2 = vadd.f32 %v1460_v10, %v1412_v51 }
 0x17b   :  { %v1487_v15 = vadd.f32 %v1486_v59, %v3241_v7  ;;  %v1513_v10 = vmul.f32 %v3265_v2, %v3265_v2 }
 0x17c   :  { %v1364_v44 = vpop.f32.mrf.mxu2 }
 0x17d   :  { %v1365_v56 = vadd.f32 %v1364_v44, %v1316_v43  ;;  %v1488_v16 = vadd.f32 %v1487_v15, %v3243_v34 }
 0x17e   :  { %v1413_v29 = vpop.f32.mrf.mxu3  ;;  %v1318_v30 = vpop.f32.mrf.mxu1 }
 0x17f   :  { %v1319_v54 = vadd.f32 %v1318_v30, %v3141_v47  ;;  %v1510_v47 = vmul.f32 %v3241_v7, %v3241_v7  ;;  %v1414_v61 = vadd.f32 %v1413_v29, %v1365_v56  ;;  %v1489_v26 = vadd.f32 %v1488_v16, %v3260_v62 }
 0x180   :  { %v1465_v31 = vpop.f32.mrf.mxu0 }
 0x181   :  { %v1525_v14 = vadd.f32 %v1524_v0, %v1510_v47  ;;  %v3272_v13 = vadd.f32 %v1462_v28, %v1414_v61  ;;  %v1490_v30 = vadd.f32 %v1489_v26, %v3265_v2 }
 0x183   :  { %v1526_v12 = vadd.f32 %v1525_v14, %v1511_v1  ;;  %v1514_v28 = vmul.f32 %v3272_v13, %v3272_v13  ;;  %v1491_v11 = vadd.f32 %v1490_v30, %v3272_v13 }
 0x184   :  { %v1367_v32 = vpop.f32.mrf.mxu2 }
 0x185   :  { %v1368_v55 = vadd.f32 %v1367_v32, %v1319_v54  ;;  %v1527_v44 = vadd.f32 %v1526_v12, %v1512_v3 }
 0x186   :  { %v1416_v33 = vpop.f32.mrf.mxu3  ;;  %v1320_v36 = vpop.f32.mrf.mxu1 }
 0x187   :  { %v1321_v53 = vadd.f32 %v1320_v36, %v3162_v8  ;;  %v1417_v8 = vadd.f32 %v1416_v33, %v1368_v55  ;;  %v1528_v33 = vadd.f32 %v1527_v44, %v1513_v10 }
 0x188   :  { %v1467_v38 = vpop.f32.mrf.mxu0 }
 0x189   :  { %v1529_v41 = vadd.f32 %v1528_v33, %v1514_v28 }
 0x18c   :  { %v1369_v46 = vpop.f32.mrf.mxu2 }
 0x18d   :  { %v1370_v63 = vadd.f32 %v1369_v46, %v1321_v53 }
 0x18e   :  { %v1418_v40 = vpop.f32.mrf.mxu3  ;;  %v1323_v18 = vpop.f32.mrf.mxu1 }
 0x18f   :  { %v1324_v5 = vadd.f32 %v1323_v18, %v3171_v21  ;;  %v1419_v6 = vadd.f32 %v1418_v40, %v1370_v63  ;;  %v3277_v21 = vadd.f32 %v1465_v31, %v1417_v8 }
 0x190   :  { %v1470_v57 = vpop.f32.mrf.mxu0 }
 0x191   :  { %v3282_v32 = vadd.f32 %v1467_v38, %v1419_v6  ;;  %v1515_v36 = vmul.f32 %v3277_v21, %v3277_v21  ;;  %v1492_v43 = vadd.f32 %v1491_v11, %v3277_v21 }
 0x193   :  { %v1516_v23 = vmul.f32 %v3282_v32, %v3282_v32  ;;  %v1530_v56 = vadd.f32 %v1529_v41, %v1515_v36  ;;  %v1493_v54 = vadd.f32 %v1492_v43, %v3282_v32 }
 0x194   :  { %v1372_v9 = vpop.f32.mrf.mxu2 }
 0x195   :  { %v1373_v19 = vadd.f32 %v1372_v9, %v1324_v5  ;;  %v1531_v48 = vadd.f32 %v1530_v56, %v1516_v23 }
 0x196   :  { %v1421_v20 = vpop.f32.mrf.mxu3  ;;  %v1325_v24 = vpop.f32.mrf.mxu1 }
 0x197   :  { %v1422_v27 = vadd.f32 %v1421_v20, %v1373_v19  ;;  %v1326_v31 = vadd.f32 %v1325_v24, %v3192_v42 }
 0x198   :  { %v1472_v29 = vpop.f32.mrf.mxu0 }
 0x199   :  { %v3287_v22 = vadd.f32 %v1470_v57, %v1422_v27 }
 0x19b   :  { %v1517_v40 = vmul.f32 %v3287_v22, %v3287_v22  ;;  %v1494_v42 = vadd.f32 %v1493_v54, %v3287_v22 }
 0x19c   :  { %v1374_v39 = vpop.f32.mrf.mxu2 }
 0x19d   :  { %v1375_v45 = vadd.f32 %v1374_v39, %v1326_v31  ;;  %v1532_v37 = vadd.f32 %v1531_v48, %v1517_v40 }
 0x19e   :  { %v1423_v38 = vpop.f32.mrf.mxu3  ;;  %v1328_v46 = vpop.f32.mrf.mxu1 }
 0x19f   :  { %v1424_v4 = vadd.f32 %v1423_v38, %v1375_v45  ;;  %v1329_v57 = vadd.f32 %v1328_v46, %v3201_v52 }
 0x1a0   :  { %v1475_v18 = vpop.f32.mrf.mxu0 }
 0x1a1   :  { %v3297_v51 = vadd.f32 %v1472_v29, %v1424_v4 }
 0x1a3   :  { %v1495_v55 = vadd.f32 %v1494_v42, %v3297_v51  ;;  %v1518_v53 = vmul.f32 %v3297_v51, %v3297_v51 }
 0x1a4   :  { %v1377_v58 = vpop.f32.mrf.mxu2 }
 0x1a5   :  { %v1533_v47 = vadd.f32 %v1532_v37, %v1518_v53  ;;  %v1378_v59 = vadd.f32 %v1377_v58, %v1329_v57 }
 0x1a6   :  { %v1426_v61 = vpop.f32.mrf.mxu3  ;;  %v1330_v63 = vpop.f32.mrf.mxu1 }
 0x1a7   :  { %v1427_v0 = vadd.f32 %v1426_v61, %v1378_v59  ;;  %v1331_v5 = vadd.f32 %v1330_v63, %v3222_v17 }
 0x1a8   :  { %v1477_v14 = vpop.f32.mrf.mxu0 }
 0x1a9   :  { %v3303_v1 = vadd.f32 %v1475_v18, %v1427_v0 }
 0x1ab   :  { %v1496_v15 = vadd.f32 %v1495_v55, %v3303_v1  ;;  %v1519_v8 = vmul.f32 %v3303_v1, %v3303_v1 }
 0x1ac   :  { %v1379_v3 = vpop.f32.mrf.mxu2 }
 0x1ad   :  { %v1534_v9 = vadd.f32 %v1533_v47, %v1519_v8  ;;  %v1380_v16 = vadd.f32 %v1379_v3, %v1331_v5 }
 0x1ae   :  { %v1428_v52 = vpop.f32.mrf.mxu3  ;;  %v1333_v6 = vpop.f32.mrf.mxu1 }
 0x1af   :  { %v1429_v19 = vadd.f32 %v1428_v52, %v1380_v16  ;;  %v1334_v24 = vadd.f32 %v1333_v6, %v3225_v25 }
 0x1b0   :  { %v1480_v29 = vpop.f32.mrf.mxu0 }
 0x1b1   :  { %v3309_v20 = vadd.f32 %v1477_v14, %v1429_v19 }
 0x1b3   :  { %v1497_v12 = vadd.f32 %v1496_v15, %v3309_v20  ;;  %v1520_v10 = vmul.f32 %v3309_v20, %v3309_v20 }
 0x1b4   :  { %v1382_v26 = vpop.f32.mrf.mxu2 }
 0x1b5   :  { %v1535_v27 = vadd.f32 %v1534_v9, %v1520_v10  ;;  %v1383_v44 = vadd.f32 %v1382_v26, %v1334_v24 }
 0x1b6   :  { %v1431_v17 = vpop.f32.mrf.mxu3  ;;  %v1335_v28 = vpop.f32.mrf.mxu1 }
 0x1b7   :  { %v1432_v30 = vadd.f32 %v1431_v17, %v1383_v44  ;;  %v1336_v31 = vadd.f32 %v1335_v28, %v3229_v35 }
 0x1b8   :  { %v1482_v45 = vpop.f32.mrf.mxu0 }
 0x1b9   :  { %v3315_v33 = vadd.f32 %v1480_v29, %v1432_v30 }
 0x1bb   :  { %v1498_v11 = vadd.f32 %v1497_v12, %v3315_v33  ;;  %v1521_v36 = vmul.f32 %v3315_v33, %v3315_v33 }
 0x1bc   :  { %v1384_v39 = vpop.f32.mrf.mxu2 }
 0x1bd   :  { %v1536_v41 = vadd.f32 %v1535_v27, %v1521_v36  ;;  %v1385_v43 = vadd.f32 %v1384_v39, %v1336_v31  ;;  %v2419_v27 = vld [vmem:[%s3442_s4] sm:$0xff]  }
 0x1be   :  { %v1433_v25 = vpop.f32.mrf.mxu3  ;;  %v2420_v39 = vunpack.c.l.bf16 %v2419_v27 }
 0x1bf   :  { %v1434_v23 = vadd.f32 %v1433_v25, %v1385_v43 }
 0x1c1   :  { %v3321_v38 = vadd.f32 %v1482_v45, %v1434_v23 }
 0x1c3   :  { %v1499_v46 = vadd.f32 %v1498_v11, %v3321_v38  ;;  %v1522_v56 = vmul.f32 %v3321_v38, %v3321_v38 }
 0x1c5   :  { %v1500_v54 = vrot.slane %v1499_v46, 4  ;;  %v1537_v40 = vadd.f32 %v1536_v41, %v1522_v56  ;;  %v2421_v41 = vunpack.c.h.bf16 %v2419_v27 }
 0x1c7   :  { %v1501_v4 = vadd.f32 %v1500_v54, %v1499_v46  ;;  %v1538_v48 = vrot.slane %v1537_v40, 4 }
 0x1c9   :  { %v1502_v42 = vrot.slane %v1501_v4, 2  ;;  %v1539_v18 = vadd.f32 %v1538_v48, %v1537_v40 }
 0x1cb   :  { %v1503_v35 = vadd.f32 %v1502_v42, %v1501_v4  ;;  %v1540_v37 = vrot.slane %v1539_v18, 2  ;;  %v2451_v4 = vld [vmem:[%s3442_s4 + $0x10] sm:$0xff]  }
 0x1cd   :  { %v1504_v55 = vrot.slane %v1503_v35, 1  ;;  %v1541_v53 = vadd.f32 %v1540_v37, %v1539_v18  ;;  %v2452_v37 = vld [vmem:[%s3442_s4 + $0x18] sm:$0xff]  }
 0x1cf   :  { %v1505_v57 = vadd.f32 %v1504_v55, %v1503_v35  ;;  %v1542_v58 = vrot.slane %v1541_v53, 1 }
 0x1d1   :  { %v1506_v47 = vmul.f32 0.0078125, %v1505_v57  ;;  %v1543_v59 = vadd.f32 %v1542_v58, %v1541_v53  ;;  %v2428_v58 = vunpack.c.l.bf16 %v2451_v4 }
 0x1d3   :  { %v1544_v61 = vmul.f32 0.0078125, %v1543_v59  ;;  %v1545_v63 = vmul.f32 %v1506_v47, %v1506_v47  ;;  %v1571_v15 = vsub.f32 %v3287_v22, %v1506_v47  ;;  %v1572_v8 = vsub.f32 %v3297_v51, %v1506_v47  ;;  %v1559_v51 = vld [vmem:[%s3441_s2] sm:$0x1] }
 0x1d4   :  { %v1573_v5 = vsub.f32 %v3303_v1, %v1506_v47  ;;  %v1574_v3 = vsub.f32 %v3309_v20, %v1506_v47  ;;  %v1575_v9 = vsub.f32 %v3315_v33, %v1506_v47  ;;  %v1576_v16 = vsub.f32 %v3321_v38, %v1506_v47 }
 0x1d5   :  { %v1546_v0 = vsub.f32 %v1544_v61, %v1545_v63  ;;  %v1561_v26 = vsub.f32 %v3232_v50, %v1506_v47  ;;  %v1562_v44 = vsub.f32 %v3235_v49, %v1506_v47  ;;  %v1563_v17 = vsub.f32 %v3238_v60, %v1506_v47  ;;  %v2453_v63 = vld [vmem:[%s3442_s4 + $0x20] sm:$0xff]  }
 0x1d6   :  { %v1564_v29 = vsub.f32 %v3241_v7, %v1506_v47  ;;  %v1565_v30 = vsub.f32 %v3243_v34, %v1506_v47  ;;  %v1566_v28 = vsub.f32 %v3260_v62, %v1506_v47  ;;  %v1567_v33 = vsub.f32 %v3265_v2, %v1506_v47  ;;  %v3351_v7 = vld [vmem:[%s3440_s3] ss:$0 sm:$0xff] }
 0x1d7   :  { %v1547_v14 = vmax.f32 %v1546_v0, 0.0  ;;  %v1568_v11 = vsub.f32 %v3272_v13, %v1506_v47  ;;  %v1569_v50 = vsub.f32 %v3277_v21, %v1506_v47  ;;  %v1570_v31 = vsub.f32 %v3282_v32, %v1506_v47  ;;  %v2450_v21 = vld [vmem:[%s3442_s4 + $0x8] sm:$0xff]  }
 0x1d8   :  { %v2424_v35 = vunpack.c.l.bf16 %v2450_v21  ;;  %v2425_v53 = vunpack.c.h.bf16 %v2450_v21  ;;  %v2429_v59 = vunpack.c.h.bf16 %v2451_v4  ;;  %v2432_v61 = vunpack.c.l.bf16 %v2452_v37 }
 0x1d9   :  { %v1548_v52 = vadd.f32 1e-05, %v1547_v14 }
 0x1db   :  { %2482 = vrsqrt.f32 %v1548_v52  ;;  %vm1555_vm1 = vweird.f32 %v1548_v52 }
 0x1e1   :  { %v2483_v6 = vpop.eup %2482 }
 0x1e2   :  { %v1550_v19 = vmul.f32 %v2483_v6, %v1548_v52  ;;  %vm1556_vm0 = vweird.f32 %v2483_v6 }
 0x1e3   :  { %vm1557_vm2 = vmor %vm1555_vm1, %vm1556_vm0 }
 0x1e4   :  { %v1551_v12 = vmul.f32 %v2483_v6, %v1550_v19  ;;  %v2437_v19 = vunpack.c.h.bf16 %v2453_v63 }
 0x1e6   :  { %v1552_v10 = vmul.f32 0.5, %v1551_v12 }
 0x1e8   :  { %v1553_v24 = vsub.f32 1.5, %v1552_v10 }
 0x1ea   :  { %v1554_v22 = vmul.f32 %v2483_v6, %v1553_v24 }
 0x1ec   :  { %v1558_v1 = vsel %vm1557_vm2, %v2483_v6, %v1554_v22  ;;  %v2436_v6 = vunpack.c.l.bf16 %v2453_v63 }
 0x1ed   :  { %v1560_v20 = vmul.f32 %v1559_v51, %v1558_v1  ;;  %v2455_v51 = vld [vmem:[%s3442_s4 + $0x30] sm:$0xff]  }
 0x1ef   :  { %v1577_v36 = vperm.slane %v1560_v20, 0 }
 0x1f1   :  { %v1578_v49 = vmul.f32 %v1577_v36, %v1561_v26  ;;  %v1579_v43 = vmul.f32 %v1577_v36, %v1562_v44  ;;  %v1580_v60 = vmul.f32 %v1577_v36, %v1563_v17  ;;  %v1581_v25 = vmul.f32 %v1577_v36, %v1564_v29 }
 0x1f2   :  { %v1582_v34 = vmul.f32 %v1577_v36, %v1565_v30  ;;  %v1583_v62 = vmul.f32 %v1577_v36, %v1566_v28  ;;  %v1584_v2 = vmul.f32 %v1577_v36, %v1567_v33  ;;  %v1585_v13 = vmul.f32 %v1577_v36, %v1568_v11  ;;  %v2456_v30 = vld [vmem:[%s3442_s4 + $0x38] sm:$0xff]  }
 0x1f3   :  { %v1586_v32 = vmul.f32 %v1577_v36, %v1569_v50  ;;  %v1587_v23 = vmul.f32 %v1577_v36, %v1570_v31  ;;  %v1588_v45 = vmul.f32 %v1577_v36, %v1571_v15  ;;  %v1589_v38 = vmul.f32 %v1577_v36, %v1572_v8  ;;  %v2454_v15 = vld [vmem:[%s3442_s4 + $0x28] sm:$0xff]  }
 0x1f4   :  { %v1590_v46 = vmul.f32 %v1577_v36, %v1573_v5  ;;  %v1591_v56 = vmul.f32 %v1577_v36, %v1574_v3  ;;  %v1592_v54 = vmul.f32 %v1577_v36, %v1575_v9  ;;  %v1593_v40 = vmul.f32 %v1577_v36, %v1576_v16 }
 0x1f5   :  { %v1598_v48 = vadd.f32 %v3351_v7, %v1578_v49  ;;  %v1599_v42 = vadd.f32 %v3351_v7, %v1579_v43  ;;  %v1600_v18 = vadd.f32 %v3351_v7, %v1580_v60  ;;  %v1601_v55 = vadd.f32 %v3351_v7, %v1581_v25 }
 0x1f6   :  { %v1602_v57 = vadd.f32 %v3351_v7, %v1582_v34  ;;  %v1603_v47 = vadd.f32 %v3351_v7, %v1583_v62  ;;  %v1604_v0 = vadd.f32 %v3351_v7, %v1584_v2  ;;  %v1605_v3 = vadd.f32 %v3351_v7, %v1585_v13 }
 0x1f7   :  { %v1646_v8 = vadd.f32 %v2420_v39, %v1598_v48  ;;  %v1647_v5 = vadd.f32 %v2421_v41, %v1599_v42  ;;  %v1648_v14 = vadd.f32 %v2424_v35, %v1600_v18  ;;  %v2433_v9 = vunpack.c.h.bf16 %v2452_v37 }
 0x1f8   :  { %v1649_v16 = vadd.f32 %v2425_v53, %v1601_v55  ;;  %v1606_v52 = vadd.f32 %v3351_v7, %v1586_v32  ;;  %v1650_v12 = vadd.f32 %v2428_v58, %v1602_v57  ;;  %v1607_v10 = vadd.f32 %v3351_v7, %v1587_v23 }
 0x1f9   :  { %v1608_v24 = vadd.f32 %v3351_v7, %v1588_v45  ;;  %v2440_v22 = vunpack.c.l.bf16 %v2454_v15  ;;  %v1651_v1 = vadd.f32 %v2429_v59, %v1603_v47  ;;  %v1652_v20 = vadd.f32 %v2432_v61, %v1604_v0 }
 0x1fa   :  { %v1662_v26 = vmax.f32 %v1646_v8, 0.0  ;;  %v1663_v27 = vmax.f32 %v1647_v5, 0.0  ;;  %v1664_v44 = vmax.f32 %v1648_v14, 0.0  ;;  %v1609_v17 = vadd.f32 %v3351_v7, %v1589_v38 }
 0x1fb   :  { %v2441_v29 = vunpack.c.h.bf16 %v2454_v15  ;;  %v1653_v28 = vadd.f32 %v2433_v9, %v1605_v3  ;;  %v1665_v33 = vmax.f32 %v1649_v16, 0.0  ;;  %v1610_v11 = vadd.f32 %v3351_v7, %v1590_v46 }
 0x1fc   :  { %v2444_v36 = vunpack.c.l.bf16 %v2455_v51  ;;  %v1654_v50 = vadd.f32 %v2436_v6, %v1606_v52  ;;  %v1666_v31 = vmax.f32 %v1650_v12, 0.0  ;;  %1678 = vst [vmem:[%s3443_s5] sm:$0xff] %v1662_v26  ;;  %v1611_v39 = vadd.f32 %v3351_v7, %v1591_v56 }
 0x1fd   :  { %v2445_v41 = vunpack.c.h.bf16 %v2455_v51  ;;  %v1655_v49 = vadd.f32 %v2437_v19, %v1607_v10  ;;  %v1667_v43 = vmax.f32 %v1651_v1, 0.0  ;;  %1679 = vst [vmem:[%s3443_s5 + $0x8] sm:$0xff] %v1663_v27  ;;  %v1612_v60 = vadd.f32 %v3351_v7, %v1592_v54 }
 0x1fe   :  { %v2448_v25 = vunpack.c.l.bf16 %v2456_v30  ;;  %v1656_v34 = vadd.f32 %v2440_v22, %v1608_v24  ;;  %v1668_v62 = vmax.f32 %v1652_v20, 0.0  ;;  %1680 = vst [vmem:[%s3443_s5 + $0x10] sm:$0xff] %v1664_v44  ;;  %v1613_v2 = vadd.f32 %v3351_v7, %v1593_v40 }
 0x1ff   :  { %v2449_v13 = vunpack.c.h.bf16 %v2456_v30  ;;  %v1657_v21 = vadd.f32 %v2441_v29, %v1609_v17  ;;  %v1669_v32 = vmax.f32 %v1653_v28, 0.0  ;;  %1681 = vst [vmem:[%s3443_s5 + $0x18] sm:$0xff] %v1665_v33  ;;  %v1658_v23 = vadd.f32 %v2444_v36, %v1610_v11 }
 0x200   :  { %v1670_v45 = vmax.f32 %v1654_v50, 0.0  ;;  %1682 = vst [vmem:[%s3443_s5 + $0x20] sm:$0xff] %v1666_v31  ;;  %v1659_v38 = vadd.f32 %v2445_v41, %v1611_v39  ;;  %v1671_v46 = vmax.f32 %v1655_v49, 0.0  ;;  %v1660_v7 = vadd.f32 %v2448_v25, %v1612_v60 }
 0x201   :  { %1683 = vst [vmem:[%s3443_s5 + $0x28] sm:$0xff] %v1667_v43  ;;  %v1672_v56 = vmax.f32 %v1656_v34, 0.0  ;;  %v1661_v54 = vadd.f32 %v2449_v13, %v1613_v2  ;;  %v1673_v40 = vmax.f32 %v1657_v21, 0.0  ;;  %v1674_v4 = vmax.f32 %v1658_v23, 0.0 }
 0x202   :  { %1684 = vst [vmem:[%s3443_s5 + $0x30] sm:$0xff] %v1668_v62  ;;  %v1675_v48 = vmax.f32 %v1659_v38, 0.0  ;;  %v1676_v42 = vmax.f32 %v1660_v7, 0.0 }
 0x203   :  { %1685 = vst [vmem:[%s3443_s5 + $0x38] sm:$0xff] %v1669_v32  ;;  %v1677_v18 = vmax.f32 %v1661_v54, 0.0 }
 0x204   :  { %1686 = vst [vmem:[%s3443_s5 + $0x40] sm:$0xff] %v1670_v45 }
 0x205   :  { %1687 = vst [vmem:[%s3443_s5 + $0x48] sm:$0xff] %v1671_v46 }
 0x206   :  { %1688 = vst [vmem:[%s3443_s5 + $0x50] sm:$0xff] %v1672_v56 }
 0x207   :  { %1689 = vst [vmem:[%s3443_s5 + $0x58] sm:$0xff] %v1673_v40 }
 0x208   :  { %1690 = vst [vmem:[%s3443_s5 + $0x60] sm:$0xff] %v1674_v4 }
 0x209   :  { %1691 = vst [vmem:[%s3443_s5 + $0x68] sm:$0xff] %v1675_v48 }
 0x20a   :  { %1692 = vst [vmem:[%s3443_s5 + $0x70] sm:$0xff] %v1676_v42 }
 0x20b   :  { %1693 = vst [vmem:[%s3443_s5 + $0x78] sm:$0xff] %v1677_v18 }

</bundles_post_ra>
